<compile_context>
chip_gen: v6e
topology: v6e:2x2x1
jax: 0.10.0
libtpu: 0.0.40
codegen_flags: <defaults>
</compile_context>

<pallas_src>
import jax
import jax.numpy as jnp
import numpy as np
from jax.experimental import pallas as pl
from jax.experimental.pallas import tpu as pltpu

LOG_SIG_MIN = -20.0
LOG_SIG_MAX = 2.0
LANES = 128

CFG = dict(
    obs_dim=12,        # env.observation_space.shape[0]
    em_dim=8,          # np.prod(example_embedding.shape)
    act_dim=4,         # env.action_space.shape[0]  -> network output = 2*act_dim
    base_hidden=32,    # hidden_shapes = [base_hidden, D]
    D=32,              # base/em_base output width == module_hidden
    GH=32,             # gating_hidden
    L=4,               # num_layers
    M=4,               # num_modules
    num_gating_layers=2,
)


# ----------------------------------------------------------------------------------
# pure-JAX reference on the ORIGINAL (unfused, unpacked) parameter list
# ----------------------------------------------------------------------------------
def _lin(x, w, b):
    return jnp.dot(x, w, preferred_element_type=jnp.float32) + b


def _softmax_last(v):
    m = jnp.max(v, axis=-1, keepdims=True)
    e = jnp.exp(v - m)
    return e / jnp.sum(e, axis=-1, keepdims=True)


def _policy_math_ref(x, e, noise, params, cfg):
    """Reference forward. Returns (action, list_of_weight_blocks (B, M) each)."""
    D, GH, L, M, A = cfg["D"], cfg["GH"], cfg["L"], cfg["M"], cfg["act_dim"]
    MM = M * M
    it = iter(params)
    nxt = lambda: next(it)

    bw0, bb0 = nxt(), nxt()
    bw1, bb1 = nxt(), nxt()
    ew0, eb0 = nxt(), nxt()
    gfc = [(nxt(), nxt()) for _ in range(cfg["num_gating_layers"])]
    gw0_w, gw0_b = nxt(), nxt()
    cond_fcs, gwt_fcs = [], []
    for _ in range(L - 2):
        cond_fcs.append((nxt(), nxt()))
        gwt_fcs.append((nxt(), nxt()))
    condL_w, condL_b = nxt(), nxt()
    glast_w, glast_b = nxt(), nxt()
    mod_w, mod_b = nxt(), nxt()
    last_w, last_b = nxt(), nxt()

    relu = lambda v: jnp.maximum(v, 0.0)

    h = relu(_lin(x, bw0, bb0))
    out = _lin(h, bw1, bb1)
    emb = _lin(e, ew0, eb0)
    emb = emb * out
    out = relu(out)

    emb = relu(emb)
    for wi, bi in gfc[:-1]:
        emb = relu(_lin(emb, wi, bi))
    emb = _lin(emb, *gfc[-1])

    def split_softmax(raw):
        return [_softmax_last(raw[:, j * M:(j + 1) * M]) for j in range(M)]

    weights = []
    raw = _lin(relu(emb), gw0_w, gw0_b)
    weights.append(split_softmax(raw))

    def cond_matmul(cw, cb, wts):
        cond = cb
        for p_idx, wlist in enumerate(wts):
            for j in range(M):
                r0 = p_idx * MM + j * M
                cond = cond + jnp.dot(wlist[j], cw[r0:r0 + M, :],
                                      preferred_element_type=jnp.float32)
        return cond

    for (cw, cb), (fw, fb) in zip(cond_fcs, gwt_fcs):
        cond = relu(cond_matmul(cw, cb, weights) * emb)
        raw = _lin(cond, fw, fb)
        weights.append(split_softmax(raw))

    cond = relu(cond_matmul(condL_w, condL_b, weights) * emb)
    last_weight = _softmax_last(_lin(cond, glast_w, glast_b))

    mo = [_lin(out, mod_w[0, j], mod_b[0, j]) for j in range(M)]
    for i in range(L - 1):
        new_mo = []
        for j in range(M):
            wij = weights[i][j]
            minp = jnp.zeros_like(mo[0])
            for k in range(M):
                minp = minp + mo[k] * wij[:, k:k + 1]
            minp = relu(minp)
            new_mo.append(_lin(minp, mod_w[i + 1, j], mod_b[i + 1, j]))
        mo = new_mo

    outv = jnp.zeros_like(mo[0])
    for j in range(M):
        outv = outv + mo[j] * last_weight[:, j:j + 1]
    outv = relu(outv)
    outv = _lin(outv, last_w, last_b)

    mean = outv[:, :A]
    log_std = jnp.clip(outv[:, A:], LOG_SIG_MIN, LOG_SIG_MAX)
    std = jnp.exp(log_std)
    action = jnp.tanh(mean + std * noise)

    gw_blocks = [wlist[j] for wlist in weights for j in range(M)] + [last_weight]
    return action, gw_blocks


# ----------------------------------------------------------------------------------
# parameter fusion + packing (done ONCE at init): one (R, 128) f32 operand
# ----------------------------------------------------------------------------------
def _round8(n):
    return ((n + 7) // 8) * 8


def pack_params(params, cfg):
    """Fuse the module linears and pack every parameter into one (R, 128) f32 array.

    Returns (packed jnp.ndarray, layout dict name -> (row_offset, rows, cols)).
    Row offsets are multiples of 8 (sublane-aligned)."""
    L, M, D = cfg["L"], cfg["M"], cfg["D"]
    MD = M * D

    it = iter(params)
    nxt = lambda: next(it)
    entries = []

    def add(name, arr):
        arr = np.asarray(arr, np.float32)
        assert arr.ndim == 2 and arr.shape[1] <= LANES
        entries.append((name, arr))

    add("bw0", nxt()); add("bb0", nxt())
    add("bw1", nxt()); add("bb1", nxt())
    add("ew0", nxt()); add("eb0", nxt())
    for g in range(cfg["num_gating_layers"]):
        add(f"gf{g}_w", nxt()); add(f"gf{g}_b", nxt())
    add("gw0_w", nxt()); add("gw0_b", nxt())
    for k in range(L - 2):
        add(f"cond{k}_w", nxt()); add(f"cond{k}_b", nxt())
        add(f"gwt{k}_w", nxt()); add(f"gwt{k}_b", nxt())
    add("condL_w", nxt()); add("condL_b", nxt())
    add("glast_w", nxt()); add("glast_b", nxt())

    mod_w = np.asarray(nxt(), np.float32)   # (L, M, D, D)
    mod_b = np.asarray(nxt(), np.float32)   # (L, M, 1, D)

    # layer 0: every module consumes the same input -> concat outputs -> (D, M*D) lane-dense slab
    add("mod0_w", np.concatenate([mod_w[0, j] for j in range(M)], axis=1))
    add("mod0_b", np.concatenate([mod_b[0, j] for j in range(M)], axis=1))
    # layers 1..L-1: per-module inputs -> block-diagonal (M*D, M*D) = one 128x128 MXU tile
    for l in range(1, L):
        bd = np.zeros((MD, MD), np.float32)
        for j in range(M):
            bd[j * D:(j + 1) * D, j * D:(j + 1) * D] = mod_w[l, j]
        add(f"modbd{l}_w", bd)
        add(f"modbd{l}_b", np.concatenate([mod_b[l, j] for j in range(M)], axis=1))

    add("last_w", nxt()); add("last_b", nxt())

    layout = {}
    off = 0
    for name, arr in entries:
        r, c = arr.shape
        layout[name] = (off, r, c)
        off += _round8(r)
    packed = np.zeros((off, LANES), np.float32)
    for name, arr in entries:
        o, r, c = layout[name]
        packed[o:o + r, :c] = arr
    return jnp.asarray(packed), layout


# ----------------------------------------------------------------------------------
# Pallas kernel
# ----------------------------------------------------------------------------------
def _make_kernel(cfg, layout):
    obs, em, A = cfg["obs_dim"], cfg["em_dim"], cfg["act_dim"]
    D, L, M = cfg["D"], cfg["L"], cfg["M"]
    MM, MD = M * M, M * D
    GW = (L - 1) * MM + M
    NGL = cfg["num_gating_layers"]

    def kernel(xin_ref, pk_ref, out_ref):
        B = xin_ref.shape[0]

        def P(name):                         # static-offset window load from the packed params
            o, r, c = layout[name]
            return pk_ref[o:o + r, 0:c]

        relu = lambda v: jnp.maximum(v, 0.0)

        def lin(x, wname, bname):
            return jnp.dot(x, P(wname), preferred_element_type=jnp.float32) + P(bname)

        x = xin_ref[:, 0:obs]
        e = xin_ref[:, obs:obs + em]
        noise = xin_ref[:, obs + em:obs + em + A]

        # --- base / em_base (null last activation) ---
        h = relu(lin(x, "bw0", "bb0"))
        out = lin(h, "bw1", "bb1")                    # (B, D)
        embv = lin(e, "ew0", "eb0")                   # (B, D)
        embv = embv * out                             # cond_ob=True
        out = relu(out)

        # --- gating trunk ---
        embv = relu(embv)
        for g in range(NGL - 1):
            embv = relu(lin(embv, f"gf{g}_w", f"gf{g}_b"))
        embv = lin(embv, f"gf{NGL - 1}_w", f"gf{NGL - 1}_b")    # (B, GH)

        # --- routing weights: vectorized grouped softmax ---
        def grouped_softmax(raw_flat):                # (B, MM) -> ((B, M, M), (B, MM))
            r3 = raw_flat.reshape(B, M, M)
            mx = jnp.max(r3, axis=-1, keepdims=True)
            ex = jnp.exp(r3 - mx)
            w3 = ex / jnp.sum(ex, axis=-1, keepdims=True)
            return w3, w3.reshape(B, MM)

        w3_list, wflat_list = [], []
        raw = lin(relu(embv), "gw0_w", "gw0_b")
        w3, wf = grouped_softmax(raw)
        w3_list.append(w3); wflat_list.append(wf)

        for k in range(L - 2):
            cat = jnp.concatenate(wflat_list, axis=-1)          # (B, (k+1)*MM)
            cond = relu(lin(cat, f"cond{k}_w", f"cond{k}_b") * embv)
            raw = lin(cond, f"gwt{k}_w", f"gwt{k}_b")
            w3, wf = grouped_softmax(raw)
            w3_list.append(w3); wflat_list.append(wf)

        cat = jnp.concatenate(wflat_list, axis=-1)              # (B, (L-1)*MM)
        cond = relu(lin(cat, "condL_w", "condL_b") * embv)
        rawL = lin(cond, "glast_w", "glast_b")                  # (B, M)
        mL = jnp.max(rawL, axis=-1, keepdims=True)
        eL = jnp.exp(rawL - mL)
        last_weight = eL / jnp.sum(eL, axis=-1, keepdims=True)  # (B, M)

        # --- modular cascade: lane-dense fused matmuls + batched mixing contraction ---
        mo = lin(out, "mod0_w", "mod0_b")                       # (B, M*D) = (B, 128)
        for i in range(L - 1):
            mo3 = mo.reshape(B, M, D)                           # (B, src, D)
            minp3 = jnp.einsum("bts,bsd->btd", w3_list[i], mo3,
                               preferred_element_type=jnp.float32)
            minp = relu(minp3.reshape(B, MD))
            mo = lin(minp, f"modbd{i + 1}_w", f"modbd{i + 1}_b")  # block-diag 128x128

        mo3 = mo.reshape(B, M, D)
        outv = relu(jnp.sum(mo3 * last_weight[:, :, None], axis=1))   # (B, D)
        outv = lin(outv, "last_w", "last_b")                          # (B, 2A)

        mean = outv[:, :A]
        log_std = jnp.clip(outv[:, A:], LOG_SIG_MIN, LOG_SIG_MAX)
        std = jnp.exp(log_std)

        # TanhNormal.rsample(return_pretanh_value=False): tanh(mean + std * eps)
        action = jnp.tanh(mean + std * noise)

        # TODO(synk): exact composition of `general_weights` in the modified policy is unknown;
        #             we emit the concatenation of all flattened routing softmaxes + last_weight.
        # TODO(synk): dropout on routing weights not implemented (forward called with dropout=False).
        gw = jnp.concatenate(wflat_list + [last_weight], axis=-1)     # (B, GW)
        pad = jnp.zeros((B, LANES - A - GW), jnp.float32)
        out_ref[...] = jnp.concatenate([action, gw, pad], axis=-1)    # single lane-dense store

    return kernel


def soft_module_policy_forward(x, embedding_input, noise, packed_params, layout, cfg):
    if embedding_input is None:
        raise ValueError("embedding_input is required")
    B = x.shape[0]
    A, L, M = cfg["act_dim"], cfg["L"], cfg["M"]
    GW = (L - 1) * M * M + M

    # pack the three small inputs into one operand -> one input DMA
    xin = jnp.concatenate([x.astype(jnp.float32),
                           embedding_input.astype(jnp.float32),
                           noise.astype(jnp.float32)], axis=-1)

    kernel = _make_kernel(cfg, layout)
    # TODO(synk): for large batches (B >= 128) add a batch grid with
    #             dimension_semantics=("parallel",) to use both v7x TensorCores.
    out = pl.pallas_call(
        kernel,
        out_shape=jax.ShapeDtypeStruct((B, LANES), jnp.float32),
        in_specs=[pl.BlockSpec(memory_space=pltpu.MemorySpace.VMEM),
                  pl.BlockSpec(memory_space=pltpu.MemorySpace.VMEM)],
        out_specs=pl.BlockSpec(memory_space=pltpu.MemorySpace.VMEM),
    )(xin, packed_params)

    action = out[:, :A]
    gweights = out[:, A:A + GW]
    return action, gweights


# ----------------------------------------------------------------------------------
# deterministic parameter construction (synthetic; mirrors the module's __init__ shapes)
# ----------------------------------------------------------------------------------
def _linear_init(key, fan_in, fan_out):
    kw, kb = jax.random.split(key)
    s = 1.0 / np.sqrt(fan_in)
    w = jax.random.uniform(kw, (fan_in, fan_out), jnp.float32, -s, s)
    b = jax.random.uniform(kb, (1, fan_out), jnp.float32, -s, s)
    return w, b


def make_params(key, cfg):
    obs, em, A = cfg["obs_dim"], cfg["em_dim"], cfg["act_dim"]
    H, D, GH, L, M = cfg["base_hidden"], cfg["D"], cfg["GH"], cfg["L"], cfg["M"]
    MM = M * M
    ki = iter(jax.random.split(key, 32))
    p = []
    p += list(_linear_init(next(ki), obs, H))                 # base fc0
    p += list(_linear_init(next(ki), H, D))                   # base fc1
    p += list(_linear_init(next(ki), em, D))                  # em_base fc0
    for g in range(cfg["num_gating_layers"]):                 # gating trunk
        in_dim = D if g == 0 else GH
        p += list(_linear_init(next(ki), in_dim, GH))
    p += list(_linear_init(next(ki), GH, MM))                 # gating_weight_fc_0
    for k in range(L - 2):
        p += list(_linear_init(next(ki), (k + 1) * MM, GH))   # gating_weight_cond_fc_{k+1}
        p += list(_linear_init(next(ki), GH, MM))             # gating_weight_fc_{k+1}
    p += list(_linear_init(next(ki), (L - 1) * MM, GH))       # gating_weight_cond_last
    p += list(_linear_init(next(ki), GH, M))                  # gating_weight_last
    s = 1.0 / np.sqrt(D)
    p.append(jax.random.uniform(next(ki), (L, M, D, D), jnp.float32, -s, s))   # module weights
    p.append(jax.random.uniform(next(ki), (L, M, 1, D), jnp.float32, -s, s))   # module biases
    p += list(_linear_init(next(ki), D, 2 * A))               # last head
    return p


if __name__ == "__main__":
    key = jax.random.PRNGKey(0)
    kp, kx, ke, kn = jax.random.split(key, 4)
    cfg = CFG
    params = make_params(kp, cfg)
    packed, layout = pack_params(params, cfg)      # one-time fusion + packing

    B = 8   # small batch that fills the 8-sublane dimension
    x = jax.random.normal(kx, (B, cfg["obs_dim"]), jnp.float32)
    emb_in = jax.random.normal(ke, (B, cfg["em_dim"]), jnp.float32)
    noise = jax.random.normal(kn, (B, cfg["act_dim"]), jnp.float32)   # eps for rsample

    action, gweights = soft_module_policy_forward(x, emb_in, noise, packed, layout, cfg)
    action = jax.block_until_ready(action)
    gweights = jax.block_until_ready(gweights)

    # pure-JAX reference on the ORIGINAL params (validates the fusion/packing too)
    ref_action, ref_blocks = _policy_math_ref(x, emb_in, noise, params, cfg)
    ref_gw = jnp.concatenate(ref_blocks, axis=-1)

    gw_dim = (cfg["L"] - 1) * cfg["M"] * cfg["M"] + cfg["M"]
    assert action.shape == (B, cfg["act_dim"])
    assert gweights.shape == (B, gw_dim)
    assert np.allclose(np.asarray(action), np.asarray(ref_action), atol=1e-4, rtol=1e-4)
    assert np.allclose(np.asarray(gweights), np.asarray(ref_gw), atol=1e-4, rtol=1e-4)

    print("KERNEL_OK")
</pallas_src>

<mosaic_0001>
module attributes {stable_mosaic.version = 11 : i64} {
  func.func @kernel(%arg0: memref<8x24xf32, #tpu.memory_space<vmem>>, %arg1: memref<928x128xf32, #tpu.memory_space<vmem>>, %arg2: memref<8x128xf32, #tpu.memory_space<vmem>>) attributes {dimension_semantics = [], scalar_prefetch = 0 : i64, scratch_operands = 0 : i64, tpu.core_type = #tpu.core_type<tc>} {
    %c0 = arith.constant 0 : index
    %c0_0 = arith.constant 0 : index
    %0 = vector.load %arg0[%c0, %c0_0] : memref<8x24xf32, #tpu.memory_space<vmem>>, vector<8x12xf32>
    %c0_1 = arith.constant 0 : index
    %c12 = arith.constant 12 : index
    %1 = vector.load %arg0[%c0_1, %c12] : memref<8x24xf32, #tpu.memory_space<vmem>>, vector<8x8xf32>
    %c0_2 = arith.constant 0 : index
    %c20 = arith.constant 20 : index
    %2 = vector.load %arg0[%c0_2, %c20] : memref<8x24xf32, #tpu.memory_space<vmem>>, vector<8x4xf32>
    %c0_3 = arith.constant 0 : index
    %c0_4 = arith.constant 0 : index
    %3 = vector.load %arg1[%c0_3, %c0_4] : memref<928x128xf32, #tpu.memory_space<vmem>>, vector<12x32xf32>
    %cst = arith.constant dense<0.000000e+00> : vector<8x32xf32>
    %4 = tpu.matmul %0, %3, %cst {dimension_numbers = #tpu.dot_dimension_numbers<[1], [0], [0], [1], [0, 0, 1, 1], [], []>} : vector<8x12xf32>, vector<12x32xf32>, vector<8x32xf32> -> vector<8x32xf32>
    %c16 = arith.constant 16 : index
    %c0_5 = arith.constant 0 : index
    %5 = vector.load %arg1[%c16, %c0_5] : memref<928x128xf32, #tpu.memory_space<vmem>>, vector<1x32xf32>
    %6 = vector.broadcast %5 : vector<1x32xf32> to vector<8x32xf32>
    %7 = arith.addf %4, %6 : vector<8x32xf32>
    %cst_6 = arith.constant 0.000000e+00 : f32
    %8 = vector.broadcast %cst_6 : f32 to vector<8x32xf32>
    %9 = arith.maximumf %7, %8 : vector<8x32xf32>
    %c24 = arith.constant 24 : index
    %c0_7 = arith.constant 0 : index
    %10 = vector.load %arg1[%c24, %c0_7] : memref<928x128xf32, #tpu.memory_space<vmem>>, vector<32x32xf32>
    %cst_8 = arith.constant dense<0.000000e+00> : vector<8x32xf32>
    %11 = tpu.matmul %9, %10, %cst_8 {dimension_numbers = #tpu.dot_dimension_numbers<[1], [0], [0], [1], [0, 0, 1, 1], [], []>} : vector<8x32xf32>, vector<32x32xf32>, vector<8x32xf32> -> vector<8x32xf32>
    %c56 = arith.constant 56 : index
    %c0_9 = arith.constant 0 : index
    %12 = vector.load %arg1[%c56, %c0_9] : memref<928x128xf32, #tpu.memory_space<vmem>>, vector<1x32xf32>
    %13 = vector.broadcast %12 : vector<1x32xf32> to vector<8x32xf32>
    %14 = arith.addf %11, %13 : vector<8x32xf32>
    %c64 = arith.constant 64 : index
    %c0_10 = arith.constant 0 : index
    %15 = vector.load %arg1[%c64, %c0_10] : memref<928x128xf32, #tpu.memory_space<vmem>>, vector<8x32xf32>
    %cst_11 = arith.constant dense<0.000000e+00> : vector<8x32xf32>
    %16 = tpu.matmul %1, %15, %cst_11 {dimension_numbers = #tpu.dot_dimension_numbers<[1], [0], [0], [1], [0, 0, 1, 1], [], []>} : vector<8x8xf32>, vector<8x32xf32>, vector<8x32xf32> -> vector<8x32xf32>
    %c72 = arith.constant 72 : index
    %c0_12 = arith.constant 0 : index
    %17 = vector.load %arg1[%c72, %c0_12] : memref<928x128xf32, #tpu.memory_space<vmem>>, vector<1x32xf32>
    %18 = vector.broadcast %17 : vector<1x32xf32> to vector<8x32xf32>
    %19 = arith.addf %16, %18 : vector<8x32xf32>
    %20 = arith.mulf %19, %14 : vector<8x32xf32>
    %cst_13 = arith.constant 0.000000e+00 : f32
    %21 = vector.broadcast %cst_13 : f32 to vector<8x32xf32>
    %22 = arith.maximumf %14, %21 : vector<8x32xf32>
    %cst_14 = arith.constant 0.000000e+00 : f32
    %23 = vector.broadcast %cst_14 : f32 to vector<8x32xf32>
    %24 = arith.maximumf %20, %23 : vector<8x32xf32>
    %c80 = arith.constant 80 : index
    %c0_15 = arith.constant 0 : index
    %25 = vector.load %arg1[%c80, %c0_15] : memref<928x128xf32, #tpu.memory_space<vmem>>, vector<32x32xf32>
    %cst_16 = arith.constant dense<0.000000e+00> : vector<8x32xf32>
    %26 = tpu.matmul %24, %25, %cst_16 {dimension_numbers = #tpu.dot_dimension_numbers<[1], [0], [0], [1], [0, 0, 1, 1], [], []>} : vector<8x32xf32>, vector<32x32xf32>, vector<8x32xf32> -> vector<8x32xf32>
    %c112 = arith.constant 112 : index
    %c0_17 = arith.constant 0 : index
    %27 = vector.load %arg1[%c112, %c0_17] : memref<928x128xf32, #tpu.memory_space<vmem>>, vector<1x32xf32>
    %28 = vector.broadcast %27 : vector<1x32xf32> to vector<8x32xf32>
    %29 = arith.addf %26, %28 : vector<8x32xf32>
    %cst_18 = arith.constant 0.000000e+00 : f32
    %30 = vector.broadcast %cst_18 : f32 to vector<8x32xf32>
    %31 = arith.maximumf %29, %30 : vector<8x32xf32>
    %c120 = arith.constant 120 : index
    %c0_19 = arith.constant 0 : index
    %32 = vector.load %arg1[%c120, %c0_19] : memref<928x128xf32, #tpu.memory_space<vmem>>, vector<32x32xf32>
    %cst_20 = arith.constant dense<0.000000e+00> : vector<8x32xf32>
    %33 = tpu.matmul %31, %32, %cst_20 {dimension_numbers = #tpu.dot_dimension_numbers<[1], [0], [0], [1], [0, 0, 1, 1], [], []>} : vector<8x32xf32>, vector<32x32xf32>, vector<8x32xf32> -> vector<8x32xf32>
    %c152 = arith.constant 152 : index
    %c0_21 = arith.constant 0 : index
    %34 = vector.load %arg1[%c152, %c0_21] : memref<928x128xf32, #tpu.memory_space<vmem>>, vector<1x32xf32>
    %35 = vector.broadcast %34 : vector<1x32xf32> to vector<8x32xf32>
    %36 = arith.addf %33, %35 : vector<8x32xf32>
    %cst_22 = arith.constant 0.000000e+00 : f32
    %37 = vector.broadcast %cst_22 : f32 to vector<8x32xf32>
    %38 = arith.maximumf %36, %37 : vector<8x32xf32>
    %c160 = arith.constant 160 : index
    %c0_23 = arith.constant 0 : index
    %39 = vector.load %arg1[%c160, %c0_23] : memref<928x128xf32, #tpu.memory_space<vmem>>, vector<32x16xf32>
    %cst_24 = arith.constant dense<0.000000e+00> : vector<8x16xf32>
    %40 = tpu.matmul %38, %39, %cst_24 {dimension_numbers = #tpu.dot_dimension_numbers<[1], [0], [0], [1], [0, 0, 1, 1], [], []>} : vector<8x32xf32>, vector<32x16xf32>, vector<8x16xf32> -> vector<8x16xf32>
    %c192 = arith.constant 192 : index
    %c0_25 = arith.constant 0 : index
    %41 = vector.load %arg1[%c192, %c0_25] : memref<928x128xf32, #tpu.memory_space<vmem>>, vector<1x16xf32>
    %42 = vector.broadcast %41 : vector<1x16xf32> to vector<8x16xf32>
    %43 = arith.addf %40, %42 : vector<8x16xf32>
    %44 = vector.shape_cast %43 : vector<8x16xf32> to vector<8x4x4xf32>
    %cst_26 = arith.constant dense<0xFF800000> : vector<8x4xf32>
    %45 = vector.multi_reduction <maximumf>, %44, %cst_26 [2] : vector<8x4x4xf32> to vector<8x4xf32>
    %46 = vector.shape_cast %45 : vector<8x4xf32> to vector<8x4x1xf32>
    %47 = vector.broadcast %46 : vector<8x4x1xf32> to vector<8x4x4xf32>
    %48 = arith.subf %44, %47 : vector<8x4x4xf32>
    %49 = math.exp %48 : vector<8x4x4xf32>
    %cst_27 = arith.constant dense<0.000000e+00> : vector<8x4xf32>
    %50 = vector.multi_reduction <add>, %49, %cst_27 [2] : vector<8x4x4xf32> to vector<8x4xf32>
    %51 = vector.shape_cast %50 : vector<8x4xf32> to vector<8x4x1xf32>
    %52 = vector.broadcast %51 : vector<8x4x1xf32> to vector<8x4x4xf32>
    %53 = arith.divf %49, %52 : vector<8x4x4xf32>
    %54 = vector.shape_cast %53 : vector<8x4x4xf32> to vector<8x16xf32>
    %c200 = arith.constant 200 : index
    %c0_28 = arith.constant 0 : index
    %55 = vector.load %arg1[%c200, %c0_28] : memref<928x128xf32, #tpu.memory_space<vmem>>, vector<16x32xf32>
    %cst_29 = arith.constant dense<0.000000e+00> : vector<8x32xf32>
    %56 = tpu.matmul %54, %55, %cst_29 {dimension_numbers = #tpu.dot_dimension_numbers<[1], [0], [0], [1], [0, 0, 1, 1], [], []>} : vector<8x16xf32>, vector<16x32xf32>, vector<8x32xf32> -> vector<8x32xf32>
    %c216 = arith.constant 216 : index
    %c0_30 = arith.constant 0 : index
    %57 = vector.load %arg1[%c216, %c0_30] : memref<928x128xf32, #tpu.memory_space<vmem>>, vector<1x32xf32>
    %58 = vector.broadcast %57 : vector<1x32xf32> to vector<8x32xf32>
    %59 = arith.addf %56, %58 : vector<8x32xf32>
    %60 = arith.mulf %59, %36 : vector<8x32xf32>
    %cst_31 = arith.constant 0.000000e+00 : f32
    %61 = vector.broadcast %cst_31 : f32 to vector<8x32xf32>
    %62 = arith.maximumf %60, %61 : vector<8x32xf32>
    %c224 = arith.constant 224 : index
    %c0_32 = arith.constant 0 : index
    %63 = vector.load %arg1[%c224, %c0_32] : memref<928x128xf32, #tpu.memory_space<vmem>>, vector<32x16xf32>
    %cst_33 = arith.constant dense<0.000000e+00> : vector<8x16xf32>
    %64 = tpu.matmul %62, %63, %cst_33 {dimension_numbers = #tpu.dot_dimension_numbers<[1], [0], [0], [1], [0, 0, 1, 1], [], []>} : vector<8x32xf32>, vector<32x16xf32>, vector<8x16xf32> -> vector<8x16xf32>
    %c256 = arith.constant 256 : index
    %c0_34 = arith.constant 0 : index
    %65 = vector.load %arg1[%c256, %c0_34] : memref<928x128xf32, #tpu.memory_space<vmem>>, vector<1x16xf32>
    %66 = vector.broadcast %65 : vector<1x16xf32> to vector<8x16xf32>
    %67 = arith.addf %64, %66 : vector<8x16xf32>
    %68 = vector.shape_cast %67 : vector<8x16xf32> to vector<8x4x4xf32>
    %cst_35 = arith.constant dense<0xFF800000> : vector<8x4xf32>
    %69 = vector.multi_reduction <maximumf>, %68, %cst_35 [2] : vector<8x4x4xf32> to vector<8x4xf32>
    %70 = vector.shape_cast %69 : vector<8x4xf32> to vector<8x4x1xf32>
    %71 = vector.broadcast %70 : vector<8x4x1xf32> to vector<8x4x4xf32>
    %72 = arith.subf %68, %71 : vector<8x4x4xf32>
    %73 = math.exp %72 : vector<8x4x4xf32>
    %cst_36 = arith.constant dense<0.000000e+00> : vector<8x4xf32>
    %74 = vector.multi_reduction <add>, %73, %cst_36 [2] : vector<8x4x4xf32> to vector<8x4xf32>
    %75 = vector.shape_cast %74 : vector<8x4xf32> to vector<8x4x1xf32>
    %76 = vector.broadcast %75 : vector<8x4x1xf32> to vector<8x4x4xf32>
    %77 = arith.divf %73, %76 : vector<8x4x4xf32>
    %78 = vector.shape_cast %77 : vector<8x4x4xf32> to vector<8x16xf32>
    %79 = tpu.concatenate %54, %78 in 1 : vector<8x16xf32>, vector<8x16xf32> -> vector<8x32xf32>
    %c264 = arith.constant 264 : index
    %c0_37 = arith.constant 0 : index
    %80 = vector.load %arg1[%c264, %c0_37] : memref<928x128xf32, #tpu.memory_space<vmem>>, vector<32x32xf32>
    %cst_38 = arith.constant dense<0.000000e+00> : vector<8x32xf32>
    %81 = tpu.matmul %79, %80, %cst_38 {dimension_numbers = #tpu.dot_dimension_numbers<[1], [0], [0], [1], [0, 0, 1, 1], [], []>} : vector<8x32xf32>, vector<32x32xf32>, vector<8x32xf32> -> vector<8x32xf32>
    %c296 = arith.constant 296 : index
    %c0_39 = arith.constant 0 : index
    %82 = vector.load %arg1[%c296, %c0_39] : memref<928x128xf32, #tpu.memory_space<vmem>>, vector<1x32xf32>
    %83 = vector.broadcast %82 : vector<1x32xf32> to vector<8x32xf32>
    %84 = arith.addf %81, %83 : vector<8x32xf32>
    %85 = arith.mulf %84, %36 : vector<8x32xf32>
    %cst_40 = arith.constant 0.000000e+00 : f32
    %86 = vector.broadcast %cst_40 : f32 to vector<8x32xf32>
    %87 = arith.maximumf %85, %86 : vector<8x32xf32>
    %c304 = arith.constant 304 : index
    %c0_41 = arith.constant 0 : index
    %88 = vector.load %arg1[%c304, %c0_41] : memref<928x128xf32, #tpu.memory_space<vmem>>, vector<32x16xf32>
    %cst_42 = arith.constant dense<0.000000e+00> : vector<8x16xf32>
    %89 = tpu.matmul %87, %88, %cst_42 {dimension_numbers = #tpu.dot_dimension_numbers<[1], [0], [0], [1], [0, 0, 1, 1], [], []>} : vector<8x32xf32>, vector<32x16xf32>, vector<8x16xf32> -> vector<8x16xf32>
    %c336 = arith.constant 336 : index
    %c0_43 = arith.constant 0 : index
    %90 = vector.load %arg1[%c336, %c0_43] : memref<928x128xf32, #tpu.memory_space<vmem>>, vector<1x16xf32>
    %91 = vector.broadcast %90 : vector<1x16xf32> to vector<8x16xf32>
    %92 = arith.addf %89, %91 : vector<8x16xf32>
    %93 = vector.shape_cast %92 : vector<8x16xf32> to vector<8x4x4xf32>
    %cst_44 = arith.constant dense<0xFF800000> : vector<8x4xf32>
    %94 = vector.multi_reduction <maximumf>, %93, %cst_44 [2] : vector<8x4x4xf32> to vector<8x4xf32>
    %95 = vector.shape_cast %94 : vector<8x4xf32> to vector<8x4x1xf32>
    %96 = vector.broadcast %95 : vector<8x4x1xf32> to vector<8x4x4xf32>
    %97 = arith.subf %93, %96 : vector<8x4x4xf32>
    %98 = math.exp %97 : vector<8x4x4xf32>
    %cst_45 = arith.constant dense<0.000000e+00> : vector<8x4xf32>
    %99 = vector.multi_reduction <add>, %98, %cst_45 [2] : vector<8x4x4xf32> to vector<8x4xf32>
    %100 = vector.shape_cast %99 : vector<8x4xf32> to vector<8x4x1xf32>
    %101 = vector.broadcast %100 : vector<8x4x1xf32> to vector<8x4x4xf32>
    %102 = arith.divf %98, %101 : vector<8x4x4xf32>
    %103 = vector.shape_cast %102 : vector<8x4x4xf32> to vector<8x16xf32>
    %104 = tpu.concatenate %54, %78, %103 in 1 : vector<8x16xf32>, vector<8x16xf32>, vector<8x16xf32> -> vector<8x48xf32>
    %c344 = arith.constant 344 : index
    %c0_46 = arith.constant 0 : index
    %105 = vector.load %arg1[%c344, %c0_46] : memref<928x128xf32, #tpu.memory_space<vmem>>, vector<48x32xf32>
    %cst_47 = arith.constant dense<0.000000e+00> : vector<8x32xf32>
    %106 = tpu.matmul %104, %105, %cst_47 {dimension_numbers = #tpu.dot_dimension_numbers<[1], [0], [0], [1], [0, 0, 1, 1], [], []>} : vector<8x48xf32>, vector<48x32xf32>, vector<8x32xf32> -> vector<8x32xf32>
    %c392 = arith.constant 392 : index
    %c0_48 = arith.constant 0 : index
    %107 = vector.load %arg1[%c392, %c0_48] : memref<928x128xf32, #tpu.memory_space<vmem>>, vector<1x32xf32>
    %108 = vector.broadcast %107 : vector<1x32xf32> to vector<8x32xf32>
    %109 = arith.addf %106, %108 : vector<8x32xf32>
    %110 = arith.mulf %109, %36 : vector<8x32xf32>
    %cst_49 = arith.constant 0.000000e+00 : f32
    %111 = vector.broadcast %cst_49 : f32 to vector<8x32xf32>
    %112 = arith.maximumf %110, %111 : vector<8x32xf32>
    %c400 = arith.constant 400 : index
    %c0_50 = arith.constant 0 : index
    %113 = vector.load %arg1[%c400, %c0_50] : memref<928x128xf32, #tpu.memory_space<vmem>>, vector<32x4xf32>
    %cst_51 = arith.constant dense<0.000000e+00> : vector<8x4xf32>
    %114 = tpu.matmul %112, %113, %cst_51 {dimension_numbers = #tpu.dot_dimension_numbers<[1], [0], [0], [1], [0, 0, 1, 1], [], []>} : vector<8x32xf32>, vector<32x4xf32>, vector<8x4xf32> -> vector<8x4xf32>
    %c432 = arith.constant 432 : index
    %c0_52 = arith.constant 0 : index
    %115 = vector.load %arg1[%c432, %c0_52] : memref<928x128xf32, #tpu.memory_space<vmem>>, vector<1x4xf32>
    %116 = vector.broadcast %115 : vector<1x4xf32> to vector<8x4xf32>
    %117 = arith.addf %114, %116 : vector<8x4xf32>
    %cst_53 = arith.constant dense<0xFF800000> : vector<8xf32>
    %118 = vector.multi_reduction <maximumf>, %117, %cst_53 [1] : vector<8x4xf32> to vector<8xf32>
    %119 = vector.shape_cast %118 : vector<8xf32> to vector<8x1xf32>
    %120 = vector.broadcast %119 : vector<8x1xf32> to vector<8x4xf32>
    %121 = arith.subf %117, %120 : vector<8x4xf32>
    %122 = math.exp %121 : vector<8x4xf32>
    %cst_54 = arith.constant dense<0.000000e+00> : vector<8xf32>
    %123 = vector.multi_reduction <add>, %122, %cst_54 [1] : vector<8x4xf32> to vector<8xf32>
    %124 = vector.shape_cast %123 : vector<8xf32> to vector<8x1xf32>
    %125 = vector.broadcast %124 : vector<8x1xf32> to vector<8x4xf32>
    %126 = arith.divf %122, %125 : vector<8x4xf32>
    %c440 = arith.constant 440 : index
    %c0_55 = arith.constant 0 : index
    %127 = vector.load %arg1[%c440, %c0_55] : memref<928x128xf32, #tpu.memory_space<vmem>>, vector<32x128xf32>
    %cst_56 = arith.constant dense<0.000000e+00> : vector<8x128xf32>
    %128 = tpu.matmul %22, %127, %cst_56 {dimension_numbers = #tpu.dot_dimension_numbers<[1], [0], [0], [1], [0, 0, 1, 1], [], []>} : vector<8x32xf32>, vector<32x128xf32>, vector<8x128xf32> -> vector<8x128xf32>
    %c472 = arith.constant 472 : index
    %c0_57 = arith.constant 0 : index
    %129 = vector.load %arg1[%c472, %c0_57] : memref<928x128xf32, #tpu.memory_space<vmem>>, vector<1x128xf32>
    %130 = vector.broadcast %129 : vector<1x128xf32> to vector<8x128xf32>
    %131 = arith.addf %128, %130 : vector<8x128xf32>
    %132 = vector.shape_cast %131 : vector<8x128xf32> to vector<8x4x32xf32>
    "tpu.trace_start"() <{level = 10 : i32, message = "bts,bsd->btd"}> : () -> ()
    %cst_58 = arith.constant dense<0.000000e+00> : vector<8x4x32xf32>
    %133 = tpu.matmul %53, %132, %cst_58 {dimension_numbers = #tpu.dot_dimension_numbers<[2], [1], [1], [2], [0, 0, 0, 1, 1, 2], [0], [0]>} : vector<8x4x4xf32>, vector<8x4x32xf32>, vector<8x4x32xf32> -> vector<8x4x32xf32>
    "tpu.trace_stop"() : () -> ()
    %134 = vector.shape_cast %133 : vector<8x4x32xf32> to vector<8x128xf32>
    %cst_59 = arith.constant 0.000000e+00 : f32
    %135 = vector.broadcast %cst_59 : f32 to vector<8x128xf32>
    %136 = arith.maximumf %134, %135 : vector<8x128xf32>
    %c480 = arith.constant 480 : index
    %c0_60 = arith.constant 0 : index
    %137 = vector.load %arg1[%c480, %c0_60] : memref<928x128xf32, #tpu.memory_space<vmem>>, vector<128x128xf32>
    %cst_61 = arith.constant dense<0.000000e+00> : vector<8x128xf32>
    %138 = tpu.matmul %136, %137, %cst_61 {dimension_numbers = #tpu.dot_dimension_numbers<[1], [0], [0], [1], [0, 0, 1, 1], [], []>} : vector<8x128xf32>, vector<128x128xf32>, vector<8x128xf32> -> vector<8x128xf32>
    %c608 = arith.constant 608 : index
    %c0_62 = arith.constant 0 : index
    %139 = vector.load %arg1[%c608, %c0_62] : memref<928x128xf32, #tpu.memory_space<vmem>>, vector<1x128xf32>
    %140 = vector.broadcast %139 : vector<1x128xf32> to vector<8x128xf32>
    %141 = arith.addf %138, %140 : vector<8x128xf32>
    %142 = vector.shape_cast %141 : vector<8x128xf32> to vector<8x4x32xf32>
    "tpu.trace_start"() <{level = 10 : i32, message = "bts,bsd->btd"}> : () -> ()
    %cst_63 = arith.constant dense<0.000000e+00> : vector<8x4x32xf32>
    %143 = tpu.matmul %77, %142, %cst_63 {dimension_numbers = #tpu.dot_dimension_numbers<[2], [1], [1], [2], [0, 0, 0, 1, 1, 2], [0], [0]>} : vector<8x4x4xf32>, vector<8x4x32xf32>, vector<8x4x32xf32> -> vector<8x4x32xf32>
    "tpu.trace_stop"() : () -> ()
    %144 = vector.shape_cast %143 : vector<8x4x32xf32> to vector<8x128xf32>
    %cst_64 = arith.constant 0.000000e+00 : f32
    %145 = vector.broadcast %cst_64 : f32 to vector<8x128xf32>
    %146 = arith.maximumf %144, %145 : vector<8x128xf32>
    %c616 = arith.constant 616 : index
    %c0_65 = arith.constant 0 : index
    %147 = vector.load %arg1[%c616, %c0_65] : memref<928x128xf32, #tpu.memory_space<vmem>>, vector<128x128xf32>
    %cst_66 = arith.constant dense<0.000000e+00> : vector<8x128xf32>
    %148 = tpu.matmul %146, %147, %cst_66 {dimension_numbers = #tpu.dot_dimension_numbers<[1], [0], [0], [1], [0, 0, 1, 1], [], []>} : vector<8x128xf32>, vector<128x128xf32>, vector<8x128xf32> -> vector<8x128xf32>
    %c744 = arith.constant 744 : index
    %c0_67 = arith.constant 0 : index
    %149 = vector.load %arg1[%c744, %c0_67] : memref<928x128xf32, #tpu.memory_space<vmem>>, vector<1x128xf32>
    %150 = vector.broadcast %149 : vector<1x128xf32> to vector<8x128xf32>
    %151 = arith.addf %148, %150 : vector<8x128xf32>
    %152 = vector.shape_cast %151 : vector<8x128xf32> to vector<8x4x32xf32>
    "tpu.trace_start"() <{level = 10 : i32, message = "bts,bsd->btd"}> : () -> ()
    %cst_68 = arith.constant dense<0.000000e+00> : vector<8x4x32xf32>
    %153 = tpu.matmul %102, %152, %cst_68 {dimension_numbers = #tpu.dot_dimension_numbers<[2], [1], [1], [2], [0, 0, 0, 1, 1, 2], [0], [0]>} : vector<8x4x4xf32>, vector<8x4x32xf32>, vector<8x4x32xf32> -> vector<8x4x32xf32>
    "tpu.trace_stop"() : () -> ()
    %154 = vector.shape_cast %153 : vector<8x4x32xf32> to vector<8x128xf32>
    %cst_69 = arith.constant 0.000000e+00 : f32
    %155 = vector.broadcast %cst_69 : f32 to vector<8x128xf32>
    %156 = arith.maximumf %154, %155 : vector<8x128xf32>
    %c752 = arith.constant 752 : index
    %c0_70 = arith.constant 0 : index
    %157 = vector.load %arg1[%c752, %c0_70] : memref<928x128xf32, #tpu.memory_space<vmem>>, vector<128x128xf32>
    %cst_71 = arith.constant dense<0.000000e+00> : vector<8x128xf32>
    %158 = tpu.matmul %156, %157, %cst_71 {dimension_numbers = #tpu.dot_dimension_numbers<[1], [0], [0], [1], [0, 0, 1, 1], [], []>} : vector<8x128xf32>, vector<128x128xf32>, vector<8x128xf32> -> vector<8x128xf32>
    %c880 = arith.constant 880 : index
    %c0_72 = arith.constant 0 : index
    %159 = vector.load %arg1[%c880, %c0_72] : memref<928x128xf32, #tpu.memory_space<vmem>>, vector<1x128xf32>
    %160 = vector.broadcast %159 : vector<1x128xf32> to vector<8x128xf32>
    %161 = arith.addf %158, %160 : vector<8x128xf32>
    %162 = vector.shape_cast %161 : vector<8x128xf32> to vector<8x4x32xf32>
    %163 = vector.shape_cast %126 : vector<8x4xf32> to vector<8x4x1xf32>
    %164 = vector.broadcast %163 : vector<8x4x1xf32> to vector<8x4x32xf32>
    %165 = arith.mulf %162, %164 : vector<8x4x32xf32>
    %cst_73 = arith.constant dense<0.000000e+00> : vector<8x32xf32>
    %166 = vector.multi_reduction <add>, %165, %cst_73 [1] : vector<8x4x32xf32> to vector<8x32xf32>
    %cst_74 = arith.constant 0.000000e+00 : f32
    %167 = vector.broadcast %cst_74 : f32 to vector<8x32xf32>
    %168 = arith.maximumf %166, %167 : vector<8x32xf32>
    %c888 = arith.constant 888 : index
    %c0_75 = arith.constant 0 : index
    %169 = vector.load %arg1[%c888, %c0_75] : memref<928x128xf32, #tpu.memory_space<vmem>>, vector<32x8xf32>
    %cst_76 = arith.constant dense<0.000000e+00> : vector<8x8xf32>
    %170 = tpu.matmul %168, %169, %cst_76 {dimension_numbers = #tpu.dot_dimension_numbers<[1], [0], [0], [1], [0, 0, 1, 1], [], []>} : vector<8x32xf32>, vector<32x8xf32>, vector<8x8xf32> -> vector<8x8xf32>
    %c920 = arith.constant 920 : index
    %c0_77 = arith.constant 0 : index
    %171 = vector.load %arg1[%c920, %c0_77] : memref<928x128xf32, #tpu.memory_space<vmem>>, vector<1x8xf32>
    %172 = vector.broadcast %171 : vector<1x8xf32> to vector<8x8xf32>
    %173 = arith.addf %170, %172 : vector<8x8xf32>
    %174 = vector.extract_strided_slice %173 {offsets = [0, 0], sizes = [8, 4], strides = [1, 1]} : vector<8x8xf32> to vector<8x4xf32>
    %175 = vector.extract_strided_slice %173 {offsets = [0, 4], sizes = [8, 4], strides = [1, 1]} : vector<8x8xf32> to vector<8x4xf32>
    %cst_78 = arith.constant -2.000000e+01 : f32
    %cst_79 = arith.constant 2.000000e+00 : f32
    %176 = vector.broadcast %cst_78 : f32 to vector<8x4xf32>
    %177 = arith.maximumf %176, %175 : vector<8x4xf32>
    %178 = vector.broadcast %cst_79 : f32 to vector<8x4xf32>
    %179 = arith.minimumf %178, %177 : vector<8x4xf32>
    %180 = math.exp %179 : vector<8x4xf32>
    %181 = arith.mulf %180, %2 : vector<8x4xf32>
    %182 = arith.addf %174, %181 : vector<8x4xf32>
    %183 = math.tanh %182 : vector<8x4xf32>
    %184 = tpu.concatenate %54, %78, %103, %126 in 1 : vector<8x16xf32>, vector<8x16xf32>, vector<8x16xf32>, vector<8x4xf32> -> vector<8x52xf32>
    %cst_80 = arith.constant 0.000000e+00 : f32
    %185 = vector.broadcast %cst_80 : f32 to vector<8x72xf32>
    %186 = tpu.concatenate %183, %184, %185 in 1 : vector<8x4xf32>, vector<8x52xf32>, vector<8x72xf32> -> vector<8x128xf32>
    %c0_81 = arith.constant 0 : index
    %c0_82 = arith.constant 0 : index
    %187 = vector.load %arg2[%c0_81, %c0_82] : memref<8x128xf32, #tpu.memory_space<vmem>>, vector<8x128xf32>
    tpu.vector_store %arg2[%c0_81, %c0_82], %186 {strides = array<i32>} : memref<8x128xf32, #tpu.memory_space<vmem>>, vector<8x128xf32>,
    return
  }
}

</mosaic_0001>

<bundles_post_ra>
// kernel: tpu_custom_call.1
= control target key start
LH: loop header
LB: loop body
LE: loop exit
PB: predicated region body
PF: predicated region fallthrough
CT: control target
= control target key end

     0   :  { %7 = vsyncpa [#allocation3], 0  ;;  %s6355_s0 = inlined_call_operand.hbm [shape: f32[8,24], index: 0, kind: input, shape index: {}]   ;;  %s6356_s1 = inlined_call_operand.hbm [shape: f32[928,128], index: 1, kind: input, shape index: {}]   ;;  %s6357_s2 = inlined_call_operand.hbm [shape: f32[8,128], index: 2, kind: output, shape index: {}]  }
   0x1   :  { %8 = vsyncpa [#allocation6], 0 }
   0x2   :  { %9 = vsyncpa [#allocation4], 0  ;;  %s5634_s9 = smov [#allocation2]   ;;  %s5635_s11 = smov [#allocation5]  }
   0x3   :  { %s16_s10 = sshll.u32 %s5634_s9, 4  ;;  %s25_s12 = sshll.u32 %s5635_s11, 4  ;;  %s17_s10 = int_to_ptr.vmem [resolvable:$true] %s16_s10  ;;  %s26_s12 = int_to_ptr.vmem [resolvable:$true] %s25_s12 }
   0x4   :  { %s5576_s13 = scalar_lea.vmem %s17_s10, 128  ;;  %p5581_p1 = scmp.lt.s32.totalorder %s17_s10, %s17_s10 }
   0x5   :  { %p5577_p0 = scmp.ne.s32.totalorder %s17_s10, %s5576_s13  ;;  %p5582_p2 = scmp.lt.s32.totalorder %s5576_s13, %s5576_s13 }
   0x7   :  { %p5583_p3 = por %p5582_p2, %p5581_p1 }
   0x9   :  { %p5584_p4 = pnand %p5583_p3, %p5577_p0 }
   0xb   :  { %5587 = shalt.err (!%p5584_p4)
}
   0xc   :  { %19 = dma.hbm_to_vmem [thread:$0]  %s6355_s0, 128, %s17_s10, [#allocation3]  }
   0xd   :  { %s5596_s16 = scalar_lea.vmem %s26_s12, 14848  ;;  %p5601_p6 = scmp.lt.s32.totalorder %s26_s12, %s26_s12 }
   0xe   :  { %p5597_p5 = scmp.ne.s32.totalorder %s26_s12, %s5596_s16  ;;  %p5602_p7 = scmp.lt.s32.totalorder %s5596_s16, %s5596_s16 }
  0x10   :  { %p5603_p8 = por %p5602_p7, %p5601_p6 }
  0x12   :  { %p5604_p9 = pnand %p5603_p8, %p5597_p5 }
  0x14   :  { %5607 = shalt.err (!%p5604_p9)
}
  0x15   :  { %s5636_s17 = smov 128   ;;  %s5637_s18 = smov 8  }
  0x16   :  { %31 = dma.hbm_to_vmem [thread:$0]  %s6356_s1, 14848, %s26_s12, [#allocation6], %s5636_s17, %s5636_s17, %s5637_s18  }
  0x17   :  { %5628 = dma.done.wait [#allocation3], 128  }
  0x18   :  { %5629 = vsyncadd [#allocation3], 4294967168 }
  0x19   :  { %5630 = dma.done.wait [#allocation6], 14848  }
  0x1a   :  { %5631 = vsyncadd [#allocation6], 4294952448  ;;  %v5638_v0 = vmov 0.0   ;;  %vm5639_vm0 = vmmov 0   ;;  %vm50_vm1 = vcmask 1043456   ;;  %v39_v2 = vld [vmem:[#allocation5] sm:$0xff]  ;;  %v555_v53 = vlaneseq }
  0x1b   :  { %5074 = vmatprep.subr.mxu0 %v5638_v0  ;;  %5078 = vmatprep.mubr.msk.f32.mxu0 %vm5639_vm0, %v5638_v0  ;;  %v40_v1 = vld [vmem:[#allocation5 + $0x8] sm:$0xf]  ;;  %v38_v3 = vld [vmem:[#allocation2] sm:$0xff]  ;;  %vm46_vm2 = vcmask 97280   ;;  %s5640_s0 = smov 116   ;;  %v128_v4 = vld [vmem:[#allocation5 + $0x30] sm:$0xff] }
  0x1c   :  { %5081 = vmatprep.subr.mxu1 %v5638_v0  ;;  %5089 = vmatprep.mubr.msk.f32.mxu1 %vm5639_vm0, %v5638_v0  ;;  %v127_v5 = vld [vmem:[#allocation5 + $0x28] sm:$0xff]  ;;  %v126_v6 = vld [vmem:[#allocation5 + $0x20] sm:$0xff]  ;;  %v125_v8 = vld [vmem:[#allocation5 + $0x18] sm:$0xff]  ;;  %vm216_vm3 = vcmask 64512   ;;  %vm134_vm4 = vcmask 261120   ;;  %s5641_s1 = smov 120  }
  0x1d   :  { %5075 = vmatpush3.msk.msra.mxu0 %vm50_vm1, %v40_v1  ;;  %214 = vrot.lane.b32.xlu0 %v38_v3, %s5640_s0  ;;  %v208_v7 = vld [vmem:[#allocation5 + $0x40] sm:$0xff]  ;;  %v4830_v10 = vld [vmem:[#allocation5 + $0x10] ss:$0 sm:$0xff]  ;;  %v295_v15 = vld [vmem:[#allocation5 + $0x68] sm:$0xff]  ;;  %s5642_s21 = smov 124   ;;  %v5730_v57 = vshrl.u32 %v555_v53, 7 }
  0x1e   :  { %5076 = vmatprep.subr.mxu0 %v5638_v0  ;;  %5082 = vmatpush3.msra.mxu1 %v128_v4  ;;  %v294_v16 = vld [vmem:[#allocation5 + $0x60] sm:$0xff]  ;;  %v293_v17 = vld [vmem:[#allocation5 + $0x58] sm:$0xff]  ;;  %v292_v18 = vld [vmem:[#allocation5 + $0x50] sm:$0xff]  ;;  %v5643_v51 = vmov 1983009808   ;;  %vm618_vm5 = vcmask 27648  }
  0x1f   :  { %5077 = vmatpush3.msra.mxu0 %v39_v2  ;;  %5083 = vmatprep.subr.mxu1 %v5638_v0  ;;  %v378_v19 = vld [vmem:[#allocation5 + $0x90] sm:$0xff]  ;;  %v4835_v22 = vld [vmem:[#allocation5 + $0x48] ss:$0 sm:$0xff]  ;;  %v4833_v23 = vld [vmem:[#allocation5 + $0x38] ss:$0 sm:$0xff]  ;;  %v553_v52 = vunpack.c.l.s4 %v5643_v51  ;;  %s5645_s22 = smov 4  }
  0x20   :  { %5079 = vmatmul.mubr.msk.f32.vlgmr.msra.gmra.mxu0 %vm46_vm2, %v38_v3  ;;  %5092 = vmatprep.subr.mxu0 %v5638_v0  ;;  %v377_v30 = vld [vmem:[#allocation5 + $0x88] sm:$0xff]  ;;  %v376_v31 = vld [vmem:[#allocation5 + $0x80] sm:$0xff]  ;;  %v375_v32 = vld [vmem:[#allocation5 + $0x78] sm:$0xff]  ;;  %v5644_v54 = vmov 1934713408   ;;  %s5646_s23 = smov 12  }
  0x21   :  { %5094 = vmatprep.mubr.msk.f32.mxu0 %vm5639_vm0, %v5638_v0  ;;  %5084 = vmatpush3.msra.mxu1 %v127_v5  ;;  %v461_v33 = vld [vmem:[#allocation5 + $0xb8] sm:$0xff]  ;;  %v4837_v34 = vld [vmem:[#allocation5 + $0x70] ss:$0 sm:$0xff]  ;;  %v459_v40 = vld [vmem:[#allocation5 + $0xa8] sm:$0xff]  ;;  %v585_v55 = vunpack.c.l.s4 %v5644_v54  ;;  %v554_v56 = vunpack.c.0.s8 %v553_v52  ;;  %vm787_vm6 = vcmask 31744   ;;  %vm798_vm7 = vcmask 130048  }
  0x22   :  { %5085 = vmatprep.subr.mxu1 %v5638_v0  ;;  %5093 = vmatpush3.msra.mxu0 %v208_v7  ;;  %v460_v39 = vld [vmem:[#allocation5 + $0xb0] sm:$0xff]  ;;  %v458_v41 = vld [vmem:[#allocation5 + $0xa0] sm:$0xff]  ;;  %v4839_v42 = vld [vmem:[#allocation5 + $0x98] ss:$0 sm:$0xff]  ;;  %s5647_s24 = smov 16   ;;  %s5648_s25 = smov 96  }
  0x23   :  { %5086 = vmatpush3.msra.mxu1 %v126_v6  ;;  %5097 = vmatprep.subr.mxu0 %v5638_v0  ;;  %v4841_v47 = vld [vmem:[#allocation5 + $0xc0] ss:$0 sm:$0xff]  ;;  %v586_v59 = vunpack.c.0.s8 %v585_v55  ;;  %v5733_v60 = vsub.s32 %v554_v56, %v5730_v57  ;;  %s5649_s26 = smov 32   ;;  %s5650_s27 = smov 64   ;;  %vm1641_vm8 = vcmask 392192   ;;  %vm2659_vm9 = vcmask 523264  }
  0x24   :  { %5087 = vmatprep.subr.mxu1 %v5638_v0  ;;  %vm2661_vm10 = vcmask 785408   ;;  %s5651_s28 = smov 48   ;;  %vm4619_vm11 = vcmask 257024   ;;  %s5652_s29 = smov 112   ;;  %vm4701_vm12 = vcmask 1041409   ;;  %vm4703_vm13 = vcmask 1042434  }
  0x25   :  { %5088 = vmatpush3.msra.mxu1 %v125_v8  ;;  %v5736_v4 = vsub.s32 %v586_v59, %v5730_v57  ;;  %vm4705_vm14 = vcmask 1043459   ;;  %vm4707_vm15 = vcmask 1044484   ;;  %s5653_s30 = smov [#allocation7]  }
  0x26   :  { %5108 = vmatprep.subr.mxu1 %v5638_v0  ;;  %s4820_s3 = sshll.u32 %s5653_s30, 4  ;;  %s4821_s3 = int_to_ptr.vmem [resolvable:$true] %s4820_s3 }
  0x27   :  { %s5608_s4 = scalar_lea.vmem %s4821_s3, 128  ;;  %p5613_p11 = scmp.lt.s32.totalorder %s4821_s3, %s4821_s3 }
  0x28   :  { %p5609_p10 = scmp.ne.s32.totalorder %s4821_s3, %s5608_s4  ;;  %p5614_p12 = scmp.lt.s32.totalorder %s5608_s4, %s5608_s4 }
  0x2a   :  { %p5615_p13 = por %p5614_p12, %p5613_p11 }
  0x2c   :  { %p5616_p0 = pnand %p5615_p13, %p5609_p10 }
  0x8f   :  { %v215_v9 = vpop.permute.xlu0 %214 }
  0x90   :  { %5095 = vmatmul.mubr.msk.f32.vlgmr.msra.gmra.mxu0 %vm216_vm3, %v215_v9 }
  0x91   :  { %5105 = vmatprep.mubr.msk.f32.mxu0 %vm5639_vm0, %v5638_v0  ;;  %5098 = vmatpush3.msra.mxu0 %v295_v15 }
  0x92   :  { %5099 = vmatprep.subr.mxu0 %v5638_v0 }
  0x93   :  { %5100 = vmatpush3.msra.mxu0 %v294_v16 }
  0x94   :  { %5101 = vmatprep.subr.mxu0 %v5638_v0 }
  0x95   :  { %5102 = vmatpush3.msra.mxu0 %v293_v17 }
  0x96   :  { %5103 = vmatprep.subr.mxu0 %v5638_v0 }
  0x97   :  { %5104 = vmatpush3.msra.mxu0 %v292_v18 }
  0x98   :  { %5119 = vmatprep.subr.mxu0 %v5638_v0 }
  0xe0   :  { %v120_v11 = vpop.f32.mrf.mxu0 }
  0xe1   :  { %v121_v12 = vadd.f32 %v4830_v10, %v120_v11 }
  0xe2   :  { %v5080_v13 = vpop.f32.mrf.mxu0 }
  0xe3   :  { %v124_v14 = vmax.f32 %v121_v12, 0.0 }
  0xe5   :  { %5090 = vmatmul.mubr.msk.f32.vlgmr.msra.gmra.mxu1 %vm134_vm4, %v124_v14 }
  0xe6   :  { %5116 = vmatprep.mubr.msk.f32.mxu1 %vm5639_vm0, %v5638_v0  ;;  %5109 = vmatpush3.msra.mxu1 %v378_v19 }
  0xe7   :  { %5110 = vmatprep.subr.mxu1 %v5638_v0 }
  0xe8   :  { %5111 = vmatpush3.msra.mxu1 %v377_v30 }
  0xe9   :  { %5112 = vmatprep.subr.mxu1 %v5638_v0 }
  0xea   :  { %5113 = vmatpush3.msra.mxu1 %v376_v31 }
  0xeb   :  { %5114 = vmatprep.subr.mxu1 %v5638_v0 }
  0xec   :  { %5115 = vmatpush3.msra.mxu1 %v375_v32 }
  0xed   :  { %5130 = vmatprep.subr.mxu1 %v5638_v0 }
 0x150   :  { %v285_v20 = vpop.f32.mrf.mxu0 }
 0x151   :  { %v286_v24 = vadd.f32 %v4835_v22, %v285_v20 }
 0x152   :  { %v5096_v21 = vpop.f32.mrf.mxu0 }
 0x1a5   :  { %v204_v25 = vpop.f32.mrf.mxu1 }
 0x1a6   :  { %v5705_v26 = vadd.f32 %v4833_v23, %v204_v25 }
 0x1a7   :  { %v5091_v27 = vpop.f32.mrf.mxu1 }
 0x1a8   :  { %v289_v28 = vmul.f32 %v286_v24, %v5705_v26 }
 0x1aa   :  { %v291_v29 = vmax.f32 %v289_v28, 0.0 }
 0x1ac   :  { %5106 = vmatmul.mubr.msk.f32.vlgmr.msra.gmra.mxu0 %vm134_vm4, %v291_v29 }
 0x1ad   :  { %5127 = vmatprep.mubr.msk.f32.mxu0 %vm5639_vm0, %v5638_v0  ;;  %5120 = vmatpush3.msra.mxu0 %v461_v33 }
 0x1ae   :  { %5121 = vmatprep.subr.mxu0 %v5638_v0 }
 0x1af   :  { %5122 = vmatpush3.msra.mxu0 %v460_v39 }
 0x1b0   :  { %5123 = vmatprep.subr.mxu0 %v5638_v0 }
 0x1b1   :  { %5124 = vmatpush3.msra.mxu0 %v459_v40 }
 0x1b2   :  { %5125 = vmatprep.subr.mxu0 %v5638_v0 }
 0x1b3   :  { %5126 = vmatpush3.msra.mxu0 %v458_v41 }
 0x1b4   :  { %5148 = vmatprep.subr.mxu0 %v5638_v0 }
 0x26c   :  { %v370_v35 = vpop.f32.mrf.mxu0 }
 0x26d   :  { %v371_v36 = vadd.f32 %v4837_v34, %v370_v35 }
 0x26e   :  { %v5107_v37 = vpop.f32.mrf.mxu0 }
 0x26f   :  { %v374_v38 = vmax.f32 %v371_v36, 0.0 }
 0x271   :  { %5117 = vmatmul.mubr.msk.f32.vlgmr.msra.gmra.mxu1 %vm134_vm4, %v374_v38 }
 0x272   :  { %5134 = vmatprep.mubr.msk.f32.mxu1 %vm5639_vm0, %v5638_v0 }
 0x331   :  { %v453_v43 = vpop.f32.mrf.mxu1 }
 0x332   :  { %v5721_v44 = vadd.f32 %v4839_v42, %v453_v43 }
 0x333   :  { %v5118_v45 = vpop.f32.mrf.mxu1 }
 0x334   :  { %v457_v46 = vmax.f32 %v5721_v44, 0.0 }
 0x336   :  { %5128 = vmatmul.mubr.msk.f32.vlgmr.msra.gmra.mxu0 %vm134_vm4, %v457_v46 }
 0x337   :  { %5156 = vmatprep.mubr.msk.f32.mxu0 %vm5639_vm0, %v5638_v0 }
 0x3f6   :  { %v536_v48 = vpop.f32.mrf.mxu0 }
 0x3f7   :  { %v537_v49 = vadd.f32 %v4841_v47, %v536_v48 }
 0x3f8   :  { %v5129_v50 = vpop.f32.mrf.mxu0 }
 0x3f9   :  { %544 = vrot.lane.b32.xlu1 %v537_v49, %s5641_s1  ;;  %541 = vrot.lane.b32.xlu0 %v537_v49, %s5642_s21 }
 0x3fd   :  { %547 = vrot.lane.b32.xlu1 %v537_v49, %s5640_s0 }
 0x46b   :  { %v545_v58 = vpop.permute.xlu1 %544  ;;  %v542_v63 = vpop.permute.xlu0 %541 }
 0x46c   :  { %v550_v61 = vcombine.low %v537_v49, %v545_v58  ;;  %v551_v62 = vcombine.high %v537_v49, %v545_v58 }
 0x46e   :  { %v558_v5 = vrot.slane %v550_v61, %v5733_v60  ;;  %v565_v6 = vrot.slane %v551_v62, %v5733_v60 }
 0x46f   :  { %v548_v1 = vpop.permute.xlu1 %547 }
 0x470   :  { %v566_v2 = vcombine.low %v542_v63, %v548_v1  ;;  %v567_v3 = vcombine.high %v542_v63, %v548_v1 }
 0x472   :  { %v574_v7 = vrot.slane %v566_v2, %v5733_v60  ;;  %v581_v8 = vrot.slane %v567_v3, %v5733_v60 }
 0x474   :  { %v598_v9 = vcombine.low %v565_v6, %v581_v8  ;;  %v582_v10 = vcombine.low %v558_v5, %v574_v7  ;;  %v583_v11 = vcombine.high %v558_v5, %v574_v7  ;;  %v599_v14 = vcombine.high %v565_v6, %v581_v8 }
 0x476   :  { %v606_v12 = vrot.slane %v598_v9, %v5736_v4  ;;  %v590_v13 = vrot.slane %v582_v10, %v5736_v4  ;;  %v597_v17 = vrot.slane %v583_v11, %v5736_v4  ;;  %v613_v22 = vrot.slane %v599_v14, %v5736_v4 }
 0x478   :  { %v631_v15 = vsel %vm618_vm5, %v606_v12, -inf  ;;  %v619_v16 = vsel %vm618_vm5, %v590_v13, -inf  ;;  %v614_v18 = vcombine.high %v590_v13, %v5638_v0  ;;  %v625_v19 = vsel %vm618_vm5, %v597_v17, -inf }
 0x479   :  { %632 = vmax.xlane.f32.xlu1 %v631_v15  ;;  %620 = vmax.xlane.f32.xlu0 %v619_v16  ;;  %v615_v21 = vcombine.high %v597_v17, %v5638_v0  ;;  %v637_v24 = vsel %vm618_vm5, %v613_v22, -inf  ;;  %v616_v25 = vcombine.high %v606_v12, %v5638_v0  ;;  %v617_v28 = vcombine.high %v613_v22, %v5638_v0 }
 0x47a   :  { %v622_v20 = vsel %vm618_vm5, %v614_v18, -inf }
 0x47b   :  { %v628_v23 = vsel %vm618_vm5, %v615_v21, -inf  ;;  %v634_v27 = vsel %vm618_vm5, %v616_v25, -inf  ;;  %v640_v29 = vsel %vm618_vm5, %v617_v28, -inf }
 0x47d   :  { %626 = vmax.xlane.f32.xlu0 %v625_v19  ;;  %623 = vmax.xlane.f32.xlu1 %v622_v20 }
 0x481   :  { %629 = vmax.xlane.f32.xlu0 %v628_v23  ;;  %638 = vmax.xlane.f32.xlu1 %v637_v24 }
 0x485   :  { %635 = vmax.xlane.f32.xlu0 %v634_v27 }
 0x489   :  { %641 = vmax.xlane.f32.xlu0 %v640_v29 }
 0x502   :  { %v633_v30 = vpop.xlane.xlu1 %632  ;;  %v621_v31 = vpop.xlane.xlu0 %620 }
 0x503   :  { %v643_v32 = vsub.f32 %v590_v13, %v621_v31  ;;  %v647_v34 = vsub.f32 %v606_v12, %v633_v30 }
 0x505   :  { %v651_v33 = vmul.f32 1.442695, %v643_v32  ;;  %v659_v41 = vmul.f32 1.442695, %v647_v34 }
 0x506   :  { %v627_v35 = vpop.xlane.xlu0 %626  ;;  %v624_v36 = vpop.xlane.xlu1 %623 }
 0x507   :  { %v645_v37 = vsub.f32 %v597_v17, %v627_v35  ;;  %v644_v38 = vsub.f32 %v614_v18, %v624_v36  ;;  %5463 = vpow2.f32 %v651_v33  ;;  %v792_v36 = vld [vmem:[#allocation5 + $0xd0] sm:$0xff] }
 0x508   :  { %5131 = vmatpush3.msra.mxu1 %v792_v36 }
 0x509   :  { %v655_v39 = vmul.f32 1.442695, %v645_v37  ;;  %v653_v40 = vmul.f32 1.442695, %v644_v38  ;;  %5132 = vmatprep.subr.mxu1 %v5638_v0 }
 0x50a   :  { %v630_v42 = vpop.xlane.xlu0 %629  ;;  %v639_v43 = vpop.xlane.xlu1 %638 }
 0x50b   :  { %5465 = vpow2.f32 %v655_v39  ;;  %v646_v45 = vsub.f32 %v615_v21, %v630_v42  ;;  %v649_v46 = vsub.f32 %v613_v22, %v639_v43  ;;  %v791_v43 = vld [vmem:[#allocation5 + $0xc8] sm:$0xff] }
 0x50c   :  { %5467 = vpow2.f32 %v653_v40  ;;  %5133 = vmatpush3.msra.mxu1 %v791_v43 }
 0x50d   :  { %v657_v47 = vmul.f32 1.442695, %v646_v45  ;;  %5469 = vpow2.f32 %v659_v41  ;;  %v663_v48 = vmul.f32 1.442695, %v649_v46  ;;  %5137 = vmatprep.subr.mxu1 %v5638_v0 }
 0x50e   :  { %v636_v49 = vpop.xlane.xlu0 %635 }
 0x50f   :  { %5471 = vpow2.f32 %v657_v47  ;;  %v648_v50 = vsub.f32 %v616_v25, %v636_v49 }
 0x510   :  { %5473 = vpow2.f32 %v663_v48 }
 0x511   :  { %v661_v51 = vmul.f32 1.442695, %v648_v50 }
 0x512   :  { %v642_v52 = vpop.xlane.xlu0 %641 }
 0x513   :  { %5475 = vpow2.f32 %v661_v51  ;;  %v650_v53 = vsub.f32 %v617_v28, %v642_v52 }
 0x514   :  { %v5464_v54 = vpop.eup %5463 }
 0x515   :  { %v665_v55 = vmul.f32 1.442695, %v650_v53  ;;  %v667_v56 = vsel %vm618_vm5, %v5464_v54, 0.0 }
 0x516   :  { %668 = vadd.xlane.f32.xlu1 %v667_v56 }
 0x517   :  { %5477 = vpow2.f32 %v665_v55 }
 0x518   :  { %v5466_v58 = vpop.eup %5465 }
 0x519   :  { %v5468_v59 = vpop.eup %5467  ;;  %v673_v61 = vsel %vm618_vm5, %v5466_v58, 0.0 }
 0x51a   :  { %v670_v62 = vsel %vm618_vm5, %v5468_v59, 0.0  ;;  %v5470_v63 = vpop.eup %5469  ;;  %674 = vadd.xlane.f32.xlu1 %v673_v61 }
 0x51b   :  { %671 = vadd.xlane.f32.xlu0 %v670_v62  ;;  %v679_v3 = vsel %vm618_vm5, %v5470_v63, 0.0 }
 0x51c   :  { %v5472_v1 = vpop.eup %5471 }
 0x51d   :  { %v676_v2 = vsel %vm618_vm5, %v5472_v1, 0.0  ;;  %v5474_v5 = vpop.eup %5473 }
 0x51e   :  { %680 = vadd.xlane.f32.xlu1 %v679_v3  ;;  %v685_v8 = vsel %vm618_vm5, %v5474_v5, 0.0 }
 0x51f   :  { %677 = vadd.xlane.f32.xlu0 %v676_v2 }
 0x520   :  { %v5476_v6 = vpop.eup %5475 }
 0x521   :  { %v682_v7 = vsel %vm618_vm5, %v5476_v6, 0.0 }
 0x522   :  { %686 = vadd.xlane.f32.xlu1 %v685_v8  ;;  %v874_v8 = vld [vmem:[#allocation5 + $0xe0] sm:$0xff] }
 0x523   :  { %683 = vadd.xlane.f32.xlu0 %v682_v7  ;;  %v875_v7 = vld [vmem:[#allocation5 + $0xe8] sm:$0xff] }
 0x524   :  { %v5478_v9 = vpop.eup %5477 }
 0x525   :  { %v688_v10 = vsel %vm618_vm5, %v5478_v9, 0.0 }
 0x527   :  { %689 = vadd.xlane.f32.xlu0 %v688_v10 }
 0x59f   :  { %v669_v11 = vpop.xlane.xlu1 %668 }
 0x5a3   :  { %v675_v13 = vpop.xlane.xlu1 %674 }
 0x5a4   :  { %v672_v12 = vpop.xlane.xlu0 %671 }
 0x5a5   :  { %5479 = vrcp.f32 %v672_v12 }
 0x5a6   :  { %5481 = vrcp.f32 %v675_v13 }
 0x5a7   :  { %v681_v15 = vpop.xlane.xlu1 %680 }
 0x5a8   :  { %v678_v14 = vpop.xlane.xlu0 %677 }
 0x5a9   :  { %5483 = vrcp.f32 %v678_v14 }
 0x5aa   :  { %5485 = vrcp.f32 %v669_v11 }
 0x5ab   :  { %v687_v17 = vpop.xlane.xlu1 %686  ;;  %5487 = vrcp.f32 %v681_v15  ;;  %v4845_v15 = vld [vmem:[#allocation5 + $0x100] ss:$0 sm:$0xff] }
 0x5ac   :  { %v684_v16 = vpop.xlane.xlu0 %683  ;;  %5489 = vrcp.f32 %v687_v17 }
 0x5ad   :  { %5491 = vrcp.f32 %v684_v16 }
 0x5b0   :  { %v690_v18 = vpop.xlane.xlu0 %689 }
 0x5b1   :  { %5493 = vrcp.f32 %v690_v18 }
 0x5b2   :  { %v5480_v19 = vpop.eup %5479 }
 0x5b3   :  { %v5482_v20 = vpop.eup %5481  ;;  %v5768_v24 = vmul.f32 %v5480_v19, %v5468_v59 }
 0x5b4   :  { %v5770_v25 = vmul.f32 %v5482_v20, %v5466_v58 }
 0x5b6   :  { %v5484_v21 = vpop.eup %5483 }
 0x5b7   :  { %v5766_v22 = vmul.f32 %v5484_v21, %v5472_v1  ;;  %v5486_v23 = vpop.eup %5485 }
 0x5b8   :  { %v5488_v27 = vpop.eup %5487  ;;  %v5772_v29 = vmul.f32 %v5486_v23, %v5464_v54 }
 0x5b9   :  { %v5490_v28 = vpop.eup %5489  ;;  %v715_v30 = vcombine.low %v5768_v24, %v5766_v22  ;;  %v5778_v33 = vmul.f32 %v5488_v27, %v5470_v63 }
 0x5ba   :  { %v5492_v31 = vpop.eup %5491  ;;  %v5776_v32 = vmul.f32 %v5490_v28, %v5474_v5  ;;  %v707_v34 = vcombine.low %v5772_v29, %v5770_v25  ;;  %v877_v5 = vld [vmem:[#allocation5 + $0xf8] sm:$0xff] }
 0x5bb   :  { %v5782_v37 = vmul.f32 %v5492_v31, %v5476_v6  ;;  %v722_v39 = vrot.slane %v715_v30, %v5733_v60  ;;  %v876_v6 = vld [vmem:[#allocation5 + $0xf0] sm:$0xff] }
 0x5bc   :  { %v723_v40 = vcombine.low %v5778_v33, %v5776_v32  ;;  %v714_v41 = vrot.slane %v707_v34, %v5733_v60 }
 0x5be   :  { %v5494_v35 = vpop.eup %5493  ;;  %v730_v45 = vrot.slane %v723_v40, %v5733_v60  ;;  %v740_v47 = vcombine.high %v714_v41, %v722_v39  ;;  %v739_v48 = vcombine.low %v714_v41, %v722_v39 }
 0x5bf   :  { %v5784_v38 = vmul.f32 %v5494_v35, %v5478_v9  ;;  %v4843_v9 = vld [vmem:[#allocation5 + $0xd8] ss:$0 sm:$0xff] }
 0x5c0   :  { %v754_v51 = vrot.slane %v740_v47, %v5736_v4  ;;  %v747_v53 = vrot.slane %v739_v48, %v5736_v4 }
 0x5c1   :  { %v731_v42 = vcombine.low %v5782_v37, %v5784_v38 }
 0x5c3   :  { %v738_v46 = vrot.slane %v731_v42, %v5733_v60 }
 0x5c5   :  { %v756_v49 = vcombine.high %v730_v45, %v738_v46  ;;  %v755_v50 = vcombine.low %v730_v45, %v738_v46 }
 0x5c7   :  { %v770_v52 = vrot.slane %v756_v49, %v5736_v4  ;;  %v763_v54 = vrot.slane %v755_v50, %v5736_v4 }
 0x5c9   :  { %v773_v55 = vcombine.low %v754_v51, %v770_v52  ;;  %v772_v56 = vcombine.high %v747_v53, %v763_v54  ;;  %v771_v58 = vcombine.low %v747_v53, %v763_v54  ;;  %v774_v59 = vcombine.high %v754_v51, %v770_v52 }
 0x5cb   :  { %780 = vrot.lane.b32.xlu0 %v773_v55, %s5637_s18  ;;  %776 = vrot.lane.b32.xlu1 %v772_v56, %s5645_s22 }
 0x5cf   :  { %784 = vrot.lane.b32.xlu1 %v774_v59, %s5646_s23 }
 0x63d   :  { %v777_v61 = vpop.permute.xlu1 %776  ;;  %v781_v62 = vpop.permute.xlu0 %780 }
 0x63e   :  { %v788_v63 = vsel %vm787_vm6, %v771_v58, %v777_v61 }
 0x63f   :  { %v789_v2 = vsel %vm216_vm3, %v788_v63, %v781_v62 }
 0x641   :  { %v785_v1 = vpop.permute.xlu1 %784 }
 0x642   :  { %v5806_v3 = vsel %vm46_vm2, %v789_v2, %v785_v1 }
 0x643   :  { %5135 = vmatmul.mubr.msk.f32.vlgmr.msra.gmra.mxu1 %vm798_vm7, %v5806_v3 }
 0x644   :  { %5145 = vmatprep.mubr.msk.f32.mxu1 %vm5639_vm0, %v5638_v0  ;;  %5138 = vmatpush3.msra.mxu1 %v877_v5 }
 0x645   :  { %5139 = vmatprep.subr.mxu1 %v5638_v0 }
 0x646   :  { %5140 = vmatpush3.msra.mxu1 %v876_v6 }
 0x647   :  { %5141 = vmatprep.subr.mxu1 %v5638_v0 }
 0x648   :  { %5142 = vmatpush3.msra.mxu1 %v875_v7 }
 0x649   :  { %5143 = vmatprep.subr.mxu1 %v5638_v0 }
 0x64a   :  { %5144 = vmatpush3.msra.mxu1 %v874_v8 }
 0x64b   :  { %5159 = vmatprep.subr.mxu1 %v5638_v0 }
 0x703   :  { %v868_v10 = vpop.f32.mrf.mxu1 }
 0x704   :  { %v869_v11 = vadd.f32 %v4843_v9, %v868_v10 }
 0x705   :  { %v5136_v12 = vpop.f32.mrf.mxu1 }
 0x706   :  { %v872_v13 = vmul.f32 %v869_v11, %v5721_v44 }
 0x708   :  { %v873_v14 = vmax.f32 %v872_v13, 0.0 }
 0x70a   :  { %5146 = vmatmul.mubr.msk.f32.vlgmr.msra.gmra.mxu1 %vm134_vm4, %v873_v14 }
 0x70b   :  { %5167 = vmatprep.mubr.msk.f32.mxu1 %vm5639_vm0, %v5638_v0 }
 0x7ca   :  { %v952_v16 = vpop.f32.mrf.mxu1 }
 0x7cb   :  { %v953_v17 = vadd.f32 %v4845_v15, %v952_v16 }
 0x7cc   :  { %v5147_v18 = vpop.f32.mrf.mxu1 }
 0x7cd   :  { %960 = vrot.lane.b32.xlu0 %v953_v17, %s5641_s1  ;;  %957 = vrot.lane.b32.xlu1 %v953_v17, %s5642_s21 }
 0x7d1   :  { %963 = vrot.lane.b32.xlu1 %v953_v17, %s5640_s0 }
 0x83f   :  { %v961_v19 = vpop.permute.xlu0 %960  ;;  %v958_v20 = vpop.permute.xlu1 %957 }
 0x840   :  { %v966_v21 = vcombine.low %v953_v17, %v961_v19  ;;  %v967_v23 = vcombine.high %v953_v17, %v961_v19 }
 0x842   :  { %v974_v31 = vrot.slane %v966_v21, %v5733_v60  ;;  %v981_v34 = vrot.slane %v967_v23, %v5733_v60 }
 0x843   :  { %v964_v27 = vpop.permute.xlu1 %963 }
 0x844   :  { %v982_v28 = vcombine.low %v958_v20, %v964_v27  ;;  %v983_v30 = vcombine.high %v958_v20, %v964_v27 }
 0x846   :  { %v990_v35 = vrot.slane %v982_v28, %v5733_v60  ;;  %v997_v36 = vrot.slane %v983_v30, %v5733_v60 }
 0x848   :  { %v998_v39 = vcombine.low %v974_v31, %v990_v35  ;;  %v999_v40 = vcombine.high %v974_v31, %v990_v35  ;;  %v1014_v41 = vcombine.low %v981_v34, %v997_v36  ;;  %v1015_v45 = vcombine.high %v981_v34, %v997_v36 }
 0x84a   :  { %v1022_v42 = vrot.slane %v1014_v41, %v5736_v4  ;;  %v1006_v43 = vrot.slane %v998_v39, %v5736_v4  ;;  %v1013_v48 = vrot.slane %v999_v40, %v5736_v4  ;;  %v1029_v53 = vrot.slane %v1015_v45, %v5736_v4 }
 0x84c   :  { %v1046_v46 = vsel %vm618_vm5, %v1022_v42, -inf  ;;  %v1034_v47 = vsel %vm618_vm5, %v1006_v43, -inf  ;;  %v1030_v49 = vcombine.high %v1006_v43, %v5638_v0  ;;  %v1040_v50 = vsel %vm618_vm5, %v1013_v48, -inf }
 0x84d   :  { %1047 = vmax.xlane.f32.xlu1 %v1046_v46  ;;  %1035 = vmax.xlane.f32.xlu0 %v1034_v47  ;;  %v1031_v52 = vcombine.high %v1013_v48, %v5638_v0  ;;  %v1052_v55 = vsel %vm618_vm5, %v1029_v53, -inf  ;;  %v1032_v56 = vcombine.high %v1022_v42, %v5638_v0  ;;  %v1033_v59 = vcombine.high %v1029_v53, %v5638_v0 }
 0x84e   :  { %v1037_v51 = vsel %vm618_vm5, %v1030_v49, -inf }
 0x84f   :  { %v1043_v54 = vsel %vm618_vm5, %v1031_v52, -inf  ;;  %v1049_v58 = vsel %vm618_vm5, %v1032_v56, -inf  ;;  %v1055_v61 = vsel %vm618_vm5, %v1033_v59, -inf }
 0x851   :  { %1041 = vmax.xlane.f32.xlu0 %v1040_v50  ;;  %1038 = vmax.xlane.f32.xlu1 %v1037_v51 }
 0x855   :  { %1044 = vmax.xlane.f32.xlu0 %v1043_v54  ;;  %1053 = vmax.xlane.f32.xlu1 %v1052_v55 }
 0x859   :  { %1050 = vmax.xlane.f32.xlu0 %v1049_v58 }
 0x85d   :  { %1056 = vmax.xlane.f32.xlu0 %v1055_v61 }
 0x8d6   :  { %v1048_v62 = vpop.xlane.xlu1 %1047  ;;  %v1036_v63 = vpop.xlane.xlu0 %1035 }
 0x8d7   :  { %v1058_v1 = vsub.f32 %v1006_v43, %v1036_v63  ;;  %v1062_v5 = vsub.f32 %v1022_v42, %v1048_v62 }
 0x8d9   :  { %v1066_v2 = vmul.f32 1.442695, %v1058_v1  ;;  %v1074_v12 = vmul.f32 1.442695, %v1062_v5 }
 0x8da   :  { %v1042_v6 = vpop.xlane.xlu0 %1041  ;;  %v1039_v7 = vpop.xlane.xlu1 %1038 }
 0x8db   :  { %v1060_v8 = vsub.f32 %v1013_v48, %v1042_v6  ;;  %v1059_v9 = vsub.f32 %v1030_v49, %v1039_v7  ;;  %5495 = vpow2.f32 %v1066_v2 }
 0x8dd   :  { %v1070_v10 = vmul.f32 1.442695, %v1060_v8  ;;  %v1068_v11 = vmul.f32 1.442695, %v1059_v9 }
 0x8de   :  { %v1045_v13 = vpop.xlane.xlu0 %1044  ;;  %v1054_v14 = vpop.xlane.xlu1 %1053 }
 0x8df   :  { %5497 = vpow2.f32 %v1070_v10  ;;  %v1061_v15 = vsub.f32 %v1031_v52, %v1045_v13  ;;  %v1064_v16 = vsub.f32 %v1029_v53, %v1054_v14 }
 0x8e0   :  { %5499 = vpow2.f32 %v1068_v11 }
 0x8e1   :  { %v1072_v17 = vmul.f32 1.442695, %v1061_v15  ;;  %5501 = vpow2.f32 %v1074_v12  ;;  %v1078_v18 = vmul.f32 1.442695, %v1064_v16 }
 0x8e2   :  { %v1051_v19 = vpop.xlane.xlu0 %1050 }
 0x8e3   :  { %5503 = vpow2.f32 %v1072_v17  ;;  %v1063_v20 = vsub.f32 %v1032_v56, %v1051_v19 }
 0x8e4   :  { %5505 = vpow2.f32 %v1078_v18 }
 0x8e5   :  { %v1076_v21 = vmul.f32 1.442695, %v1063_v20 }
 0x8e6   :  { %v1057_v23 = vpop.xlane.xlu0 %1056 }
 0x8e7   :  { %5507 = vpow2.f32 %v1076_v21  ;;  %v1065_v27 = vsub.f32 %v1033_v59, %v1057_v23 }
 0x8e8   :  { %v5496_v28 = vpop.eup %5495 }
 0x8e9   :  { %v1080_v30 = vmul.f32 1.442695, %v1065_v27  ;;  %v1082_v31 = vsel %vm618_vm5, %v5496_v28, 0.0 }
 0x8ea   :  { %1083 = vadd.xlane.f32.xlu1 %v1082_v31  ;;  %v1213_v31 = vld [vmem:[#allocation5 + $0x120] sm:$0xff] }
 0x8eb   :  { %5509 = vpow2.f32 %v1080_v30  ;;  %5149 = vmatpush3.msra.mxu0 %v1213_v31 }
 0x8ec   :  { %v5498_v34 = vpop.eup %5497  ;;  %5150 = vmatprep.subr.mxu0 %v5638_v0 }
 0x8ed   :  { %v5500_v35 = vpop.eup %5499  ;;  %v1088_v36 = vsel %vm618_vm5, %v5498_v34, 0.0 }
 0x8ee   :  { %v1085_v39 = vsel %vm618_vm5, %v5500_v35, 0.0  ;;  %v5502_v40 = vpop.eup %5501  ;;  %1089 = vadd.xlane.f32.xlu1 %v1088_v36 }
 0x8ef   :  { %1086 = vadd.xlane.f32.xlu0 %v1085_v39  ;;  %v1094_v43 = vsel %vm618_vm5, %v5502_v40, 0.0  ;;  %v1211_v39 = vld [vmem:[#allocation5 + $0x110] sm:$0xff] }
 0x8f0   :  { %v5504_v41 = vpop.eup %5503 }
 0x8f1   :  { %v1091_v42 = vsel %vm618_vm5, %v5504_v41, 0.0  ;;  %v5506_v45 = vpop.eup %5505 }
 0x8f2   :  { %1095 = vadd.xlane.f32.xlu1 %v1094_v43  ;;  %v1100_v48 = vsel %vm618_vm5, %v5506_v45, 0.0 }
 0x8f3   :  { %1092 = vadd.xlane.f32.xlu0 %v1091_v42 }
 0x8f4   :  { %v5508_v46 = vpop.eup %5507 }
 0x8f5   :  { %v1097_v47 = vsel %vm618_vm5, %v5508_v46, 0.0 }
 0x8f6   :  { %1101 = vadd.xlane.f32.xlu1 %v1100_v48 }
 0x8f7   :  { %1098 = vadd.xlane.f32.xlu0 %v1097_v47 }
 0x8f8   :  { %v5510_v49 = vpop.eup %5509 }
 0x8f9   :  { %v1103_v50 = vsel %vm618_vm5, %v5510_v49, 0.0 }
 0x8fb   :  { %1104 = vadd.xlane.f32.xlu0 %v1103_v50 }
 0x973   :  { %v1084_v51 = vpop.xlane.xlu1 %1083 }
 0x977   :  { %v1090_v53 = vpop.xlane.xlu1 %1089 }
 0x978   :  { %v1087_v52 = vpop.xlane.xlu0 %1086 }
 0x979   :  { %5511 = vrcp.f32 %v1087_v52 }
 0x97a   :  { %5513 = vrcp.f32 %v1090_v53 }
 0x97b   :  { %v1096_v55 = vpop.xlane.xlu1 %1095 }
 0x97c   :  { %v1093_v54 = vpop.xlane.xlu0 %1092 }
 0x97d   :  { %5515 = vrcp.f32 %v1093_v54 }
 0x97e   :  { %5517 = vrcp.f32 %v1084_v51 }
 0x97f   :  { %v1102_v58 = vpop.xlane.xlu1 %1101  ;;  %5519 = vrcp.f32 %v1096_v55 }
 0x980   :  { %v1099_v56 = vpop.xlane.xlu0 %1098  ;;  %5521 = vrcp.f32 %v1102_v58  ;;  %v1813_v58 = vld [vmem:[#allocation5 + $0x1d0] sm:$0xff] }
 0x981   :  { %5523 = vrcp.f32 %v1099_v56 }
 0x984   :  { %v1105_v59 = vpop.xlane.xlu0 %1104 }
 0x985   :  { %5525 = vrcp.f32 %v1105_v59 }
 0x986   :  { %v5512_v61 = vpop.eup %5511 }
 0x987   :  { %v5514_v62 = vpop.eup %5513  ;;  %v5853_v5 = vmul.f32 %v5512_v61, %v5500_v35  ;;  %v1812_v61 = vld [vmem:[#allocation5 + $0x1c8] sm:$0xff] }
 0x988   :  { %v5855_v6 = vmul.f32 %v5514_v62, %v5498_v34  ;;  %v1212_v34 = vld [vmem:[#allocation5 + $0x118] sm:$0xff]  ;;  %v1811_v62 = vld [vmem:[#allocation5 + $0x1c0] sm:$0xff] }
 0x989   :  { %5151 = vmatpush3.msra.mxu0 %v1212_v34 }
 0x98a   :  { %v5516_v63 = vpop.eup %5515  ;;  %5152 = vmatprep.subr.mxu0 %v5638_v0 }
 0x98b   :  { %v5851_v1 = vmul.f32 %v5516_v63, %v5504_v41  ;;  %v5518_v2 = vpop.eup %5517  ;;  %5153 = vmatpush3.msra.mxu0 %v1211_v39  ;;  %v1810_v63 = vld [vmem:[#allocation5 + $0x1b8] sm:$0xff] }
 0x98c   :  { %v5520_v7 = vpop.eup %5519  ;;  %v5857_v9 = vmul.f32 %v5518_v2, %v5496_v28  ;;  %5154 = vmatprep.subr.mxu0 %v5638_v0  ;;  %v290_v2 = vmax.f32 %v5705_v26, 0.0  ;;  %v1294_v26 = vld [vmem:[#allocation5 + $0x130] sm:$0xff] }
 0x98d   :  { %v5522_v8 = vpop.eup %5521  ;;  %v1130_v10 = vcombine.low %v5853_v5, %v5851_v1  ;;  %v5863_v13 = vmul.f32 %v5520_v7, %v5502_v40  ;;  %v1296_v7 = vld [vmem:[#allocation5 + $0x140] sm:$0xff] }
 0x98e   :  { %v5524_v11 = vpop.eup %5523  ;;  %v5861_v12 = vmul.f32 %v5522_v8, %v5506_v45  ;;  %v1122_v14 = vcombine.low %v5857_v9, %v5855_v6  ;;  %v1210_v45 = vld [vmem:[#allocation5 + $0x108] sm:$0xff]  ;;  %v1295_v8 = vld [vmem:[#allocation5 + $0x138] sm:$0xff] }
 0x98f   :  { %v5867_v16 = vmul.f32 %v5524_v11, %v5508_v46  ;;  %v1137_v18 = vrot.slane %v1130_v10, %v5733_v60  ;;  %5155 = vmatpush3.msra.mxu0 %v1210_v45  ;;  %v4847_v10 = vld [vmem:[#allocation5 + $0x128] ss:$0 sm:$0xff] }
 0x990   :  { %v1138_v19 = vcombine.low %v5863_v13, %v5861_v12  ;;  %v1129_v20 = vrot.slane %v1122_v14, %v5733_v60  ;;  %5196 = vmatprep.subr.mxu0 %v5638_v0 }
 0x992   :  { %v5526_v15 = vpop.eup %5525  ;;  %v1145_v23 = vrot.slane %v1138_v19, %v5733_v60  ;;  %v1155_v28 = vcombine.high %v1129_v20, %v1137_v18  ;;  %v1154_v30 = vcombine.low %v1129_v20, %v1137_v18 }
 0x993   :  { %v5869_v17 = vmul.f32 %v5526_v15, %v5510_v49 }
 0x994   :  { %v1169_v40 = vrot.slane %v1155_v28, %v5736_v4  ;;  %v1162_v42 = vrot.slane %v1154_v30, %v5736_v4 }
 0x995   :  { %v1146_v21 = vcombine.low %v5867_v16, %v5869_v17 }
 0x997   :  { %v1153_v27 = vrot.slane %v1146_v21, %v5733_v60 }
 0x999   :  { %v1171_v35 = vcombine.high %v1145_v23, %v1153_v27  ;;  %v1170_v36 = vcombine.low %v1145_v23, %v1153_v27  ;;  %v4849_v23 = vld [vmem:[#allocation5 + $0x150] ss:$0 sm:$0xff] }
 0x99b   :  { %v1185_v41 = vrot.slane %v1171_v35, %v5736_v4  ;;  %v1178_v43 = vrot.slane %v1170_v36, %v5736_v4 }
 0x99d   :  { %v1188_v46 = vcombine.low %v1169_v40, %v1185_v41  ;;  %v1187_v47 = vcombine.high %v1162_v42, %v1178_v43  ;;  %v1186_v48 = vcombine.low %v1162_v42, %v1178_v43  ;;  %v1189_v49 = vcombine.high %v1169_v40, %v1185_v41 }
 0x99f   :  { %1195 = vrot.lane.b32.xlu0 %v1188_v46, %s5637_s18  ;;  %1191 = vrot.lane.b32.xlu1 %v1187_v47, %s5645_s22 }
 0x9a3   :  { %1199 = vrot.lane.b32.xlu1 %v1189_v49, %s5646_s23 }
 0xa11   :  { %v1192_v50 = vpop.permute.xlu1 %1191  ;;  %v1196_v51 = vpop.permute.xlu0 %1195 }
 0xa12   :  { %v1202_v52 = vsel %vm787_vm6, %v1186_v48, %v1192_v50 }
 0xa13   :  { %v1203_v54 = vsel %vm216_vm3, %v1202_v52, %v1196_v51 }
 0xa15   :  { %v1200_v53 = vpop.permute.xlu1 %1199 }
 0xa16   :  { %v1204_v55 = vsel %vm46_vm2, %v1203_v54, %v1200_v53 }
 0xa17   :  { %1206 = vrot.lane.b32.xlu1 %v1204_v55, %s5647_s24 }
 0xa89   :  { %v1207_v56 = vpop.permute.xlu1 %1206 }
 0xa8a   :  { %v5895_v59 = vsel %vm798_vm7, %v5806_v3, %v1207_v56  ;;  %v1297_v3 = vld [vmem:[#allocation5 + $0x148] sm:$0xff] }
 0xa8b   :  { %5157 = vmatmul.mubr.msk.f32.vlgmr.msra.gmra.mxu0 %vm134_vm4, %v5895_v59  ;;  %5160 = vmatpush3.msra.mxu1 %v1297_v3 }
 0xa8c   :  { %5197 = vmatpush3.msra.mxu0 %v1813_v58  ;;  %5204 = vmatprep.mubr.msk.f32.mxu0 %vm5639_vm0, %v5638_v0 }
 0xa8d   :  { %5198 = vmatprep.subr.mxu0 %v5638_v0  ;;  %5161 = vmatprep.subr.mxu1 %v5638_v0 }
 0xa8e   :  { %5199 = vmatpush3.msra.mxu0 %v1812_v61  ;;  %5162 = vmatpush3.msra.mxu1 %v1296_v7 }
 0xa8f   :  { %5200 = vmatprep.subr.mxu0 %v5638_v0  ;;  %5163 = vmatprep.subr.mxu1 %v5638_v0 }
 0xa90   :  { %5201 = vmatpush3.msra.mxu0 %v1811_v62  ;;  %5164 = vmatpush3.msra.mxu1 %v1295_v8 }
 0xa91   :  { %5202 = vmatprep.subr.mxu0 %v5638_v0  ;;  %5165 = vmatprep.subr.mxu1 %v5638_v0 }
 0xa92   :  { %5203 = vmatpush3.msra.mxu0 %v1810_v63  ;;  %5166 = vmatpush3.msra.mxu1 %v1294_v26 }
 0xa93   :  { %5205 = vmatmul.mubr.msk.f32.vlgmr.msra.gmra.mxu0 %vm134_vm4, %v290_v2  ;;  %5217 = vmatprep.subr.mxu0 %v5638_v0 }
 0xa94   :  { %5219 = vmatprep.mubr.msk.f32.mxu0 %vm5639_vm0, %v5638_v0  ;;  %5170 = vmatprep.subr.mxu1 %v5638_v0 }
 0xb4b   :  { %v1288_v11 = vpop.f32.mrf.mxu0 }
 0xb4c   :  { %v1289_v14 = vadd.f32 %v4847_v10, %v1288_v11 }
 0xb4d   :  { %v5158_v15 = vpop.f32.mrf.mxu0 }
 0xb4e   :  { %v1292_v18 = vmul.f32 %v1289_v14, %v5721_v44 }
 0xb50   :  { %v1293_v19 = vmax.f32 %v1292_v18, 0.0 }
 0xb52   :  { %5168 = vmatmul.mubr.msk.f32.vlgmr.msra.gmra.mxu1 %vm134_vm4, %v1293_v19 }
 0xb53   :  { %v5915_v20 = vpop.f32.mrf.mxu0  ;;  %5182 = vmatprep.mubr.msk.f32.mxu1 %vm5639_vm0, %v5638_v0 }
 0xb55   :  { %v5206_v21 = vpop.f32.mrf.mxu0 }
 0xc12   :  { %v1372_v27 = vpop.f32.mrf.mxu1 }
 0xc13   :  { %v1373_v28 = vadd.f32 %v4849_v23, %v1372_v27 }
 0xc14   :  { %v5169_v30 = vpop.f32.mrf.mxu1 }
 0xc15   :  { %1380 = vrot.lane.b32.xlu1 %v1373_v28, %s5641_s1  ;;  %1377 = vrot.lane.b32.xlu0 %v1373_v28, %s5642_s21 }
 0xc19   :  { %1383 = vrot.lane.b32.xlu0 %v1373_v28, %s5640_s0 }
 0xc87   :  { %v1381_v31 = vpop.permute.xlu1 %1380  ;;  %v1378_v34 = vpop.permute.xlu0 %1377 }
 0xc88   :  { %v1386_v35 = vcombine.low %v1373_v28, %v1381_v31  ;;  %v1387_v36 = vcombine.high %v1373_v28, %v1381_v31 }
 0xc8a   :  { %v1394_v42 = vrot.slane %v1386_v35, %v5733_v60  ;;  %v1401_v43 = vrot.slane %v1387_v36, %v5733_v60 }
 0xc8b   :  { %v1384_v39 = vpop.permute.xlu0 %1383 }
 0xc8c   :  { %v1402_v40 = vcombine.low %v1378_v34, %v1384_v39  ;;  %v1403_v41 = vcombine.high %v1378_v34, %v1384_v39 }
 0xc8e   :  { %v1410_v45 = vrot.slane %v1402_v40, %v5733_v60  ;;  %v1417_v46 = vrot.slane %v1403_v41, %v5733_v60 }
 0xc90   :  { %v1418_v47 = vcombine.low %v1394_v42, %v1410_v45  ;;  %v1419_v48 = vcombine.high %v1394_v42, %v1410_v45  ;;  %v1434_v49 = vcombine.low %v1401_v43, %v1417_v46  ;;  %v1435_v52 = vcombine.high %v1401_v43, %v1417_v46 }
 0xc92   :  { %v1433_v50 = vrot.slane %v1419_v48, %v5736_v4  ;;  %v1426_v51 = vrot.slane %v1418_v47, %v5736_v4  ;;  %v1442_v55 = vrot.slane %v1434_v49, %v5736_v4  ;;  %v1449_v58 = vrot.slane %v1435_v52, %v5736_v4 }
 0xc94   :  { %v1460_v53 = vsel %vm618_vm5, %v1433_v50, -inf  ;;  %v1454_v54 = vsel %vm618_vm5, %v1426_v51, -inf  ;;  %v1451_v56 = vcombine.high %v1433_v50, %v5638_v0  ;;  %v1466_v61 = vsel %vm618_vm5, %v1442_v55, -inf }
 0xc95   :  { %1461 = vmax.xlane.f32.xlu0 %v1460_v53  ;;  %1455 = vmax.xlane.f32.xlu1 %v1454_v54  ;;  %v1452_v63 = vcombine.high %v1442_v55, %v5638_v0  ;;  %v1450_v2 = vcombine.high %v1426_v51, %v5638_v0  ;;  %v1453_v8 = vcombine.high %v1449_v58, %v5638_v0  ;;  %v1472_v10 = vsel %vm618_vm5, %v1449_v58, -inf }
 0xc96   :  { %v1463_v62 = vsel %vm618_vm5, %v1451_v56, -inf }
 0xc97   :  { %v1469_v3 = vsel %vm618_vm5, %v1452_v63, -inf  ;;  %v1457_v7 = vsel %vm618_vm5, %v1450_v2, -inf  ;;  %v1475_v26 = vsel %vm618_vm5, %v1453_v8, -inf }
 0xc99   :  { %1467 = vmax.xlane.f32.xlu0 %v1466_v61  ;;  %1464 = vmax.xlane.f32.xlu1 %v1463_v62 }
 0xc9d   :  { %1470 = vmax.xlane.f32.xlu1 %v1469_v3  ;;  %1458 = vmax.xlane.f32.xlu0 %v1457_v7 }
 0xca1   :  { %1476 = vmax.xlane.f32.xlu1 %v1475_v26  ;;  %1473 = vmax.xlane.f32.xlu0 %v1472_v10 }
 0xd1e   :  { %v1462_v11 = vpop.xlane.xlu0 %1461  ;;  %v1456_v14 = vpop.xlane.xlu1 %1455 }
 0xd1f   :  { %v1480_v15 = vsub.f32 %v1433_v50, %v1462_v11  ;;  %v1478_v18 = vsub.f32 %v1426_v51, %v1456_v14 }
 0xd21   :  { %v1486_v19 = vmul.f32 1.442695, %v1478_v18  ;;  %v1490_v21 = vmul.f32 1.442695, %v1480_v15 }
 0xd22   :  { %v1468_v23 = vpop.xlane.xlu0 %1467  ;;  %v1465_v27 = vpop.xlane.xlu1 %1464 }
 0xd23   :  { %v1482_v28 = vsub.f32 %v1442_v55, %v1468_v23  ;;  %5527 = vpow2.f32 %v1486_v19  ;;  %v1481_v31 = vsub.f32 %v1451_v56, %v1465_v27 }
 0xd24   :  { %5529 = vpow2.f32 %v1490_v21 }
 0xd25   :  { %v1494_v30 = vmul.f32 1.442695, %v1482_v28  ;;  %v1492_v40 = vmul.f32 1.442695, %v1481_v31 }
 0xd26   :  { %v1471_v34 = vpop.xlane.xlu1 %1470  ;;  %v1459_v35 = vpop.xlane.xlu0 %1458 }
 0xd27   :  { %v1479_v36 = vsub.f32 %v1450_v2, %v1459_v35  ;;  %5531 = vpow2.f32 %v1494_v30  ;;  %v1483_v41 = vsub.f32 %v1452_v63, %v1471_v34 }
 0xd29   :  { %v1488_v39 = vmul.f32 1.442695, %v1479_v36  ;;  %v1496_v47 = vmul.f32 1.442695, %v1483_v41 }
 0xd2a   :  { %v1474_v42 = vpop.xlane.xlu0 %1473  ;;  %v1477_v43 = vpop.xlane.xlu1 %1476 }
 0xd2b   :  { %v1484_v45 = vsub.f32 %v1449_v58, %v1474_v42  ;;  %5533 = vpow2.f32 %v1488_v39  ;;  %v1485_v48 = vsub.f32 %v1453_v8, %v1477_v43 }
 0xd2c   :  { %5535 = vpow2.f32 %v1492_v40 }
 0xd2d   :  { %v1498_v46 = vmul.f32 1.442695, %v1484_v45  ;;  %v1500_v50 = vmul.f32 1.442695, %v1485_v48 }
 0xd2f   :  { %5537 = vpow2.f32 %v1498_v46 }
 0xd30   :  { %v5528_v49 = vpop.eup %5527  ;;  %5539 = vpow2.f32 %v1496_v47 }
 0xd31   :  { %v1502_v51 = vsel %vm618_vm5, %v5528_v49, 0.0  ;;  %v5530_v52 = vpop.eup %5529  ;;  %5541 = vpow2.f32 %v1500_v50 }
 0xd32   :  { %1503 = vadd.xlane.f32.xlu0 %v1502_v51  ;;  %v1508_v53 = vsel %vm618_vm5, %v5530_v52, 0.0 }
 0xd34   :  { %v5532_v54 = vpop.eup %5531 }
 0xd35   :  { %v1514_v56 = vsel %vm618_vm5, %v5532_v54, 0.0 }
 0xd36   :  { %1509 = vadd.xlane.f32.xlu0 %v1508_v53 }
 0xd38   :  { %v5534_v55 = vpop.eup %5533 }
 0xd39   :  { %v1505_v58 = vsel %vm618_vm5, %v5534_v55, 0.0  ;;  %v5536_v61 = vpop.eup %5535 }
 0xd3a   :  { %1515 = vadd.xlane.f32.xlu0 %v1514_v56  ;;  %1506 = vadd.xlane.f32.xlu1 %v1505_v58  ;;  %v1511_v63 = vsel %vm618_vm5, %v5536_v61, 0.0 }
 0xd3c   :  { %v5538_v62 = vpop.eup %5537 }
 0xd3d   :  { %v1520_v2 = vsel %vm618_vm5, %v5538_v62, 0.0  ;;  %v5540_v3 = vpop.eup %5539 }
 0xd3e   :  { %1512 = vadd.xlane.f32.xlu1 %v1511_v63  ;;  %1521 = vadd.xlane.f32.xlu0 %v1520_v2  ;;  %v1517_v7 = vsel %vm618_vm5, %v5540_v3, 0.0  ;;  %v5542_v8 = vpop.eup %5541 }
 0xd3f   :  { %v1523_v26 = vsel %vm618_vm5, %v5542_v8, 0.0 }
 0xd42   :  { %1518 = vadd.xlane.f32.xlu1 %v1517_v7 }
 0xd46   :  { %1524 = vadd.xlane.f32.xlu1 %v1523_v26 }
 0xdbb   :  { %v1504_v10 = vpop.xlane.xlu0 %1503 }
 0xdbf   :  { %v1510_v11 = vpop.xlane.xlu0 %1509 }
 0xdc0   :  { %5543 = vrcp.f32 %v1510_v11 }
 0xdc3   :  { %v1507_v14 = vpop.xlane.xlu1 %1506  ;;  %v1516_v15 = vpop.xlane.xlu0 %1515 }
 0xdc4   :  { %5545 = vrcp.f32 %v1507_v14  ;;  %v1635_v14 = vld [vmem:[#allocation5 + $0x180] sm:$0xff] }
 0xdc5   :  { %5171 = vmatpush3.msra.mxu1 %v1635_v14 }
 0xdc6   :  { %5172 = vmatprep.subr.mxu1 %v5638_v0 }
 0xdc7   :  { %v1513_v18 = vpop.xlane.xlu1 %1512  ;;  %v1522_v19 = vpop.xlane.xlu0 %1521 }
 0xdc8   :  { %5547 = vrcp.f32 %v1513_v18 }
 0xdc9   :  { %5549 = vrcp.f32 %v1504_v10 }
 0xdca   :  { %5551 = vrcp.f32 %v1522_v19  ;;  %v4855_v19 = vld [vmem:[#allocation5 + $0x1d8] ss:$0 sm:$0xff] }
 0xdcb   :  { %v1519_v21 = vpop.xlane.xlu1 %1518  ;;  %5553 = vrcp.f32 %v1516_v15  ;;  %v1634_v15 = vld [vmem:[#allocation5 + $0x178] sm:$0xff] }
 0xdcc   :  { %5555 = vrcp.f32 %v1519_v21  ;;  %v1633_v21 = vld [vmem:[#allocation5 + $0x170] sm:$0xff]  ;;  %5173 = vmatpush3.msra.mxu1 %v1634_v15  ;;  %v1718_v15 = vld [vmem:[#allocation5 + $0x198] sm:$0xff] }
 0xdcd   :  { %v5544_v27 = vpop.eup %5543  ;;  %5174 = vmatprep.subr.mxu1 %v5638_v0 }
 0xdce   :  { %v5954_v39 = vmul.f32 %v5544_v27, %v5530_v52  ;;  %v1889_v27 = vadd.f32 %v4855_v19, %v5915_v20  ;;  %5175 = vmatpush3.msra.mxu1 %v1633_v21 }
 0xdcf   :  { %v1525_v23 = vpop.xlane.xlu1 %1524  ;;  %5176 = vmatprep.subr.mxu1 %v5638_v0 }
 0xdd0   :  { %5557 = vrcp.f32 %v1525_v23  ;;  %v1632_v23 = vld [vmem:[#allocation5 + $0x168] sm:$0xff] }
 0xdd1   :  { %v5546_v28 = vpop.eup %5545  ;;  %5177 = vmatpush3.msra.mxu1 %v1632_v23 }
 0xdd2   :  { %v5952_v36 = vmul.f32 %v5546_v28, %v5534_v55  ;;  %v1631_v28 = vld [vmem:[#allocation5 + $0x160] sm:$0xff]  ;;  %5178 = vmatprep.subr.mxu1 %v5638_v0 }
 0xdd3   :  { %5179 = vmatpush3.msra.mxu1 %v1631_v28 }
 0xdd4   :  { %5180 = vmatprep.subr.mxu1 %v5638_v0 }
 0xdd5   :  { %v5548_v30 = vpop.eup %5547 }
 0xdd6   :  { %v5550_v31 = vpop.eup %5549  ;;  %v5950_v34 = vmul.f32 %v5548_v30, %v5536_v61  ;;  %v1630_v30 = vld [vmem:[#allocation5 + $0x158] sm:$0xff] }
 0xdd7   :  { %v5552_v35 = vpop.eup %5551  ;;  %v5956_v41 = vmul.f32 %v5550_v31, %v5528_v49  ;;  %5181 = vmatpush3.msra.mxu1 %v1630_v30 }
 0xdd8   :  { %v5554_v40 = vpop.eup %5553  ;;  %v5958_v42 = vmul.f32 %v5552_v35, %v5538_v62  ;;  %v1550_v43 = vcombine.low %v5952_v36, %v5950_v34  ;;  %5185 = vmatprep.subr.mxu1 %v5638_v0 }
 0xdd9   :  { %v5556_v45 = vpop.eup %5555  ;;  %v5962_v46 = vmul.f32 %v5554_v40, %v5532_v54  ;;  %v1542_v47 = vcombine.low %v5956_v41, %v5954_v39 }
 0xdda   :  { %v5966_v50 = vmul.f32 %v5556_v45, %v5540_v3  ;;  %v1557_v52 = vrot.slane %v1550_v43, %v5733_v60 }
 0xddb   :  { %v1558_v49 = vcombine.low %v5962_v46, %v5958_v42  ;;  %v1549_v53 = vrot.slane %v1542_v47, %v5733_v60 }
 0xddd   :  { %v5558_v48 = vpop.eup %5557  ;;  %v1565_v54 = vrot.slane %v1558_v49, %v5733_v60  ;;  %v1575_v58 = vcombine.high %v1549_v53, %v1557_v52  ;;  %v1574_v61 = vcombine.low %v1549_v53, %v1557_v52  ;;  %v1720_v49 = vld [vmem:[#allocation5 + $0x1a8] sm:$0xff] }
 0xdde   :  { %v5968_v51 = vmul.f32 %v5558_v48, %v5542_v8 }
 0xddf   :  { %v1589_v2 = vrot.slane %v1575_v58, %v5736_v4  ;;  %v1582_v7 = vrot.slane %v1574_v61, %v5736_v4 }
 0xde0   :  { %v1566_v55 = vcombine.low %v5966_v50, %v5968_v51 }
 0xde2   :  { %v1573_v56 = vrot.slane %v1566_v55, %v5733_v60 }
 0xde4   :  { %v1591_v62 = vcombine.high %v1565_v54, %v1573_v56  ;;  %v1590_v63 = vcombine.low %v1565_v54, %v1573_v56 }
 0xde6   :  { %v1605_v3 = vrot.slane %v1591_v62, %v5736_v4  ;;  %v1598_v8 = vrot.slane %v1590_v63, %v5736_v4 }
 0xde8   :  { %v1608_v26 = vcombine.low %v1589_v2, %v1605_v3  ;;  %v1607_v10 = vcombine.high %v1582_v7, %v1598_v8  ;;  %v1606_v11 = vcombine.low %v1582_v7, %v1598_v8  ;;  %v1609_v18 = vcombine.high %v1589_v2, %v1605_v3 }
 0xdea   :  { %1615 = vrot.lane.b32.xlu1 %v1608_v26, %s5637_s18  ;;  %1611 = vrot.lane.b32.xlu0 %v1607_v10, %s5645_s22 }
 0xdee   :  { %1619 = vrot.lane.b32.xlu1 %v1609_v18, %s5646_s23  ;;  %v4851_v18 = vld [vmem:[#allocation5 + $0x188] ss:$0 sm:$0xff] }
 0xdf2   :  { %1893 = vrot.lane.b32.xlu1 %v1889_v27, %s5648_s25 }
 0xdf6   :  { %1899 = vrot.lane.b32.xlu1 %v1889_v27, %s5649_s26 }
 0xe5c   :  { %v1616_v20 = vpop.permute.xlu1 %1615  ;;  %v1612_v31 = vpop.permute.xlu0 %1611 }
 0xe5d   :  { %v1622_v35 = vsel %vm787_vm6, %v1606_v11, %v1612_v31 }
 0xe5e   :  { %v1623_v43 = vsel %vm216_vm3, %v1622_v35, %v1616_v20  ;;  %vm4811_vm3 = vcmask 457728  }
 0xe60   :  { %v1620_v40 = vpop.permute.xlu1 %1619 }
 0xe61   :  { %v1624_v45 = vsel %vm46_vm2, %v1623_v43, %v1620_v40  ;;  %vm4713_vm2 = vcmask 1047559  }
 0xe62   :  { %1626 = vrot.lane.b32.xlu0 %v1624_v45, %s5649_s26 }
 0xe64   :  { %v1894_v47 = vpop.permute.xlu1 %1893 }
 0xe66   :  { %1896 = vrot.lane.b32.xlu0 %v1889_v27, %s5650_s27 }
 0xe68   :  { %v1900_v48 = vpop.permute.xlu1 %1899 }
 0xe69   :  { %v1918_v55 = vcombine.low %v1894_v47, %v1900_v48  ;;  %v1919_v54 = vcombine.high %v1894_v47, %v1900_v48  ;;  %v2678_v48 = vld [vmem:[#allocation5 + $0x250] sm:$0xff] }
 0xe6b   :  { %v1926_v62 = vrot.slane %v1918_v55, %v5733_v60  ;;  %v1933_v63 = vrot.slane %v1919_v54, %v5733_v60  ;;  %v2673_v55 = vld [vmem:[#allocation5 + $0x228] sm:$0xff]  ;;  %v2672_v54 = vld [vmem:[#allocation5 + $0x220] sm:$0xff] }
 0xed4   :  { %v1627_v52 = vpop.permute.xlu0 %1626 }
 0xed5   :  { %v6001_v53 = vsel %vm134_vm4, %v5895_v59, %v1627_v52  ;;  %v2677_v52 = vld [vmem:[#allocation5 + $0x248] sm:$0xff] }
 0xed6   :  { %5183 = vmatmul.mubr.msk.f32.vlgmr.msra.gmra.mxu1 %vm1641_vm8, %v6001_v53 }
 0xed7   :  { %5186 = vmatpush3.msra.mxu1 %v1720_v49  ;;  %5193 = vmatprep.mubr.msk.f32.mxu1 %vm5639_vm0, %v5638_v0  ;;  %v2675_v49 = vld [vmem:[#allocation5 + $0x238] sm:$0xff] }
 0xed8   :  { %v1897_v56 = vpop.permute.xlu0 %1896  ;;  %5187 = vmatprep.subr.mxu1 %v5638_v0 }
 0xed9   :  { %v1902_v58 = vcombine.low %v1889_v27, %v1897_v56  ;;  %v1903_v61 = vcombine.high %v1889_v27, %v1897_v56  ;;  %v2671_v56 = vld [vmem:[#allocation5 + $0x218] sm:$0xff] }
 0xedb   :  { %v1910_v59 = vrot.slane %v1902_v58, %v5733_v60  ;;  %v1917_v2 = vrot.slane %v1903_v61, %v5733_v60  ;;  %v2670_v58 = vld [vmem:[#allocation5 + $0x210] sm:$0xff]  ;;  %v2669_v61 = vld [vmem:[#allocation5 + $0x208] sm:$0xff] }
 0xedd   :  { %v1934_v3 = vcombine.low %v1910_v59, %v1926_v62  ;;  %v1935_v7 = vcombine.high %v1910_v59, %v1926_v62  ;;  %v1950_v8 = vcombine.low %v1917_v2, %v1933_v63  ;;  %v1951_v10 = vcombine.high %v1917_v2, %v1933_v63  ;;  %v2668_v62 = vld [vmem:[#allocation5 + $0x200] sm:$0xff] }
 0xedf   :  { %v1949_v26 = vrot.slane %v1935_v7, %v5736_v4  ;;  %v1958_v11 = vrot.slane %v1950_v8, %v5736_v4  ;;  %v1965_v14 = vrot.slane %v1951_v10, %v5736_v4  ;;  %v1942_v28 = vrot.slane %v1934_v3, %v5736_v4 }
 0xee1   :  { %5218 = vmatpush3.msk.msra.mxu0 %vm50_vm1, %v1949_v26  ;;  %v1966_v30 = vcombine.high %v1942_v28, %v5638_v0  ;;  %v1967_v20 = vcombine.high %v1949_v26, %v5638_v0  ;;  %v1969_v45 = vcombine.high %v1965_v14, %v5638_v0 }
 0xee2   :  { %5220 = vmatmul.mubr.msk.f32.vlgmr.msra.gmra.mxu0 %vm787_vm6, %v5770_v25  ;;  %5227 = vmatprep.subr.mxu0 %v5638_v0  ;;  %v1719_v25 = vld [vmem:[#allocation5 + $0x1a0] sm:$0xff] }
 0xee3   :  { %5228 = vmatpush3.msk.msra.mxu0 %vm50_vm1, %v1958_v11  ;;  %5229 = vmatprep.mubr.msk.f32.mxu0 %vm5639_vm0, %v5638_v0 }
 0xee4   :  { %5237 = vmatprep.subr.mxu0 %v5638_v0  ;;  %5188 = vmatpush3.msra.mxu1 %v1719_v25 }
 0xee5   :  { %5189 = vmatprep.subr.mxu1 %v5638_v0 }
 0xee6   :  { %5230 = vmatmul.mubr.msk.f32.vlgmr.msra.gmra.mxu0 %vm787_vm6, %v5778_v33  ;;  %5190 = vmatpush3.msra.mxu1 %v1718_v15  ;;  %v1717_v33 = vld [vmem:[#allocation5 + $0x190] sm:$0xff] }
 0xee7   :  { %5238 = vmatpush3.msk.msra.mxu0 %vm50_vm1, %v1965_v14  ;;  %5239 = vmatprep.mubr.msk.f32.mxu0 %vm5639_vm0, %v5638_v0 }
 0xee8   :  { %5247 = vmatprep.subr.mxu0 %v5638_v0  ;;  %5191 = vmatprep.subr.mxu1 %v5638_v0 }
 0xee9   :  { %5192 = vmatpush3.msra.mxu1 %v1717_v33  ;;  %v2667_v33 = vld [vmem:[#allocation5 + $0x1f8] sm:$0xff] }
 0xeea   :  { %5240 = vmatmul.mubr.msk.f32.vlgmr.msra.gmra.mxu0 %vm787_vm6, %v5776_v32  ;;  %5207 = vmatprep.subr.mxu1 %v5638_v0 }
 0xeeb   :  { %5279 = vmatprep.mubr.msk.f32.mxu0 %vm5639_vm0, %v5638_v0 }
 0xf96   :  { %v1711_v19 = vpop.f32.mrf.mxu1 }
 0xf97   :  { %v1712_v21 = vadd.f32 %v4851_v18, %v1711_v19  ;;  %v2666_v18 = vld [vmem:[#allocation5 + $0x1f0] sm:$0xff] }
 0xf98   :  { %v5184_v23 = vpop.f32.mrf.mxu1 }
 0xf99   :  { %v1715_v32 = vmul.f32 %v1712_v21, %v5721_v44 }
 0xf9b   :  { %v1716_v27 = vmax.f32 %v1715_v32, 0.0 }
 0xf9d   :  { %5194 = vmatmul.mubr.msk.f32.vlgmr.msra.gmra.mxu1 %vm134_vm4, %v1716_v27 }
 0xf9e   :  { %5208 = vmatpush3.msk.msra.mxu1 %vm50_vm1, %v1942_v28  ;;  %5209 = vmatprep.mubr.msk.f32.mxu1 %vm5639_vm0, %v5638_v0  ;;  %v2665_v28 = vld [vmem:[#allocation5 + $0x1e8] sm:$0xff] }
 0xf9f   :  { %5212 = vmatprep.subr.mxu1 %v5638_v0 }
 0xfa1   :  { %5210 = vmatmul.mubr.msk.f32.vlgmr.msra.gmra.mxu1 %vm787_vm6, %v5772_v29  ;;  %v1968_v29 = vcombine.high %v1958_v11, %v5638_v0 }
 0xfa2   :  { %5213 = vmatpush3.msk.msra.mxu1 %vm50_vm1, %v1966_v30  ;;  %v6047_v44 = vpop.f32.mrf.mxu0  ;;  %5214 = vmatprep.mubr.msk.f32.mxu1 %vm5639_vm0, %v5638_v0 }
 0xfa3   :  { %5222 = vmatprep.subr.mxu1 %v5638_v0 }
 0xfa4   :  { %v5221_v31 = vpop.f32.mrf.mxu0 }
 0xfa5   :  { %5215 = vmatmul.mubr.msk.f32.vlgmr.msra.gmra.mxu1 %vm787_vm6, %v5768_v24 }
 0xfa6   :  { %5223 = vmatpush3.msk.msra.mxu1 %vm50_vm1, %v1967_v20  ;;  %v6056_v35 = vpop.f32.mrf.mxu0  ;;  %5224 = vmatprep.mubr.msk.f32.mxu1 %vm5639_vm0, %v5638_v0 }
 0xfa7   :  { %5232 = vmatprep.subr.mxu1 %v5638_v0 }
 0xfa8   :  { %v5231_v40 = vpop.f32.mrf.mxu0 }
 0xfa9   :  { %5225 = vmatmul.mubr.msk.f32.vlgmr.msra.gmra.mxu1 %vm787_vm6, %v5766_v22  ;;  %v2679_v22 = vld [vmem:[#allocation5 + $0x258] sm:$0xff] }
 0xfaa   :  { %5233 = vmatpush3.msk.msra.mxu1 %vm50_vm1, %v1968_v29  ;;  %v6065_v43 = vpop.f32.mrf.mxu0  ;;  %5234 = vmatprep.mubr.msk.f32.mxu1 %vm5639_vm0, %v5638_v0  ;;  %v2664_v29 = vld [vmem:[#allocation5 + $0x1e0] sm:$0xff] }
 0xfab   :  { %v2594_v24 = vcombine.low %v6056_v35, %v6065_v43  ;;  %5242 = vmatprep.subr.mxu1 %v5638_v0  ;;  %5248 = vmatpush3.msra.mxu0 %v2679_v22 }
 0xfac   :  { %v5241_v47 = vpop.f32.mrf.mxu0  ;;  %5249 = vmatprep.subr.mxu0 %v5638_v0 }
 0xfad   :  { %5235 = vmatmul.mubr.msk.f32.vlgmr.msra.gmra.mxu1 %vm787_vm6, %v5782_v37  ;;  %5250 = vmatpush3.msra.mxu0 %v2678_v48  ;;  %v2676_v37 = vld [vmem:[#allocation5 + $0x240] sm:$0xff]  ;;  %v2601_v30 = vrot.slane %v2594_v24, %v5733_v60 }
 0xfae   :  { %5243 = vmatpush3.msk.msra.mxu1 %vm50_vm1, %v1969_v45  ;;  %5244 = vmatprep.mubr.msk.f32.mxu1 %vm5639_vm0, %v5638_v0 }
 0xfaf   :  { %5282 = vmatprep.subr.mxu1 %v5638_v0  ;;  %5251 = vmatprep.subr.mxu0 %v5638_v0 }
 0xfb0   :  { %5252 = vmatpush3.msra.mxu0 %v2677_v52 }
 0xfb1   :  { %5245 = vmatmul.mubr.msk.f32.vlgmr.msra.gmra.mxu1 %vm787_vm6, %v5784_v38  ;;  %5253 = vmatprep.subr.mxu0 %v5638_v0  ;;  %v2674_v38 = vld [vmem:[#allocation5 + $0x230] sm:$0xff] }
 0xfb2   :  { %5284 = vmatprep.mubr.msk.f32.mxu1 %vm5639_vm0, %v5638_v0  ;;  %5254 = vmatpush3.msra.mxu0 %v2676_v37 }
 0xfb3   :  { %5255 = vmatprep.subr.mxu0 %v5638_v0 }
 0xfb4   :  { %5256 = vmatpush3.msra.mxu0 %v2675_v49 }
 0xfb5   :  { %5257 = vmatprep.subr.mxu0 %v5638_v0 }
 0xfb6   :  { %5258 = vmatpush3.msra.mxu0 %v2674_v38 }
 0xfb7   :  { %5259 = vmatprep.subr.mxu0 %v5638_v0 }
 0xfb8   :  { %5260 = vmatpush3.msra.mxu0 %v2673_v55 }
 0xfb9   :  { %5261 = vmatprep.subr.mxu0 %v5638_v0 }
 0xfba   :  { %5262 = vmatpush3.msra.mxu0 %v2672_v54 }
 0xfbb   :  { %5263 = vmatprep.subr.mxu0 %v5638_v0 }
 0xfbc   :  { %5264 = vmatpush3.msra.mxu0 %v2671_v56 }
 0xfbd   :  { %5265 = vmatprep.subr.mxu0 %v5638_v0 }
 0xfbe   :  { %5266 = vmatpush3.msra.mxu0 %v2670_v58 }
 0xfbf   :  { %5267 = vmatprep.subr.mxu0 %v5638_v0 }
 0xfc0   :  { %5268 = vmatpush3.msra.mxu0 %v2669_v61 }
 0xfc1   :  { %5269 = vmatprep.subr.mxu0 %v5638_v0 }
 0xfc2   :  { %5270 = vmatpush3.msra.mxu0 %v2668_v62  ;;  %v4873_v62 = vld [vmem:[#allocation5 + $0x260] ss:$0 sm:$0xff] }
 0xfc3   :  { %5271 = vmatprep.subr.mxu0 %v5638_v0 }
 0xfc4   :  { %5272 = vmatpush3.msra.mxu0 %v2667_v33 }
 0xfc5   :  { %5273 = vmatprep.subr.mxu0 %v5638_v0 }
 0xfc6   :  { %5274 = vmatpush3.msra.mxu0 %v2666_v18 }
 0xfc7   :  { %5275 = vmatprep.subr.mxu0 %v5638_v0 }
 0xfc8   :  { %5276 = vmatpush3.msra.mxu0 %v2665_v28 }
 0xfc9   :  { %5277 = vmatprep.subr.mxu0 %v5638_v0 }
 0xfca   :  { %5278 = vmatpush3.msra.mxu0 %v2664_v29  ;;  %v3536_v29 = vld [vmem:[#allocation5 + $0x2c0] sm:$0xff] }
 0xfcb   :  { %5322 = vmatprep.subr.mxu0 %v5638_v0 }
0x105d   :  { %v6095_v63 = vpop.f32.mrf.mxu1 }
0x105f   :  { %v5195_v59 = vpop.f32.mrf.mxu1 }
0x1061   :  { %v2042_v2 = vpop.f32.mrf.mxu1 }
0x1062   :  { %v2578_v25 = vcombine.low %v2042_v2, %v6047_v44 }
0x1063   :  { %v5211_v3 = vpop.f32.mrf.mxu1 }
0x1064   :  { %v2585_v23 = vrot.slane %v2578_v25, %v5733_v60 }
0x1065   :  { %v2118_v7 = vpop.f32.mrf.mxu1 }
0x1067   :  { %v5216_v8 = vpop.f32.mrf.mxu1 }
0x1069   :  { %v2270_v26 = vpop.f32.mrf.mxu1 }
0x106a   :  { %v2586_v11 = vcombine.low %v2118_v7, %v2270_v26 }
0x106b   :  { %v5226_v10 = vpop.f32.mrf.mxu1 }
0x106c   :  { %v2593_v19 = vrot.slane %v2586_v11, %v5733_v60 }
0x106d   :  { %v2422_v14 = vpop.f32.mrf.mxu1 }
0x106e   :  { %v2610_v44 = vcombine.low %v2585_v23, %v2593_v19  ;;  %v2611_v20 = vcombine.high %v2585_v23, %v2593_v19 }
0x106f   :  { %v5236_v15 = vpop.f32.mrf.mxu1 }
0x1070   :  { %v2625_v47 = vrot.slane %v2611_v20, %v5736_v4  ;;  %v2618_v35 = vrot.slane %v2610_v44, %v5736_v4  ;;  %v3539_v20 = vld [vmem:[#allocation5 + $0x2d8] sm:$0xff] }
0x1071   :  { %v2574_v21 = vpop.f32.mrf.mxu1 }
0x1072   :  { %v2602_v32 = vcombine.low %v2422_v14, %v2574_v21 }
0x1073   :  { %v5246_v27 = vpop.f32.mrf.mxu1 }
0x1074   :  { %v2609_v31 = vrot.slane %v2602_v32, %v5733_v60 }
0x1076   :  { %v2626_v40 = vcombine.low %v2601_v30, %v2609_v31  ;;  %v2627_v45 = vcombine.high %v2601_v30, %v2609_v31  ;;  %v3538_v31 = vld [vmem:[#allocation5 + $0x2d0] sm:$0xff] }
0x1078   :  { %v2641_v22 = vrot.slane %v2627_v45, %v5736_v4  ;;  %v2634_v43 = vrot.slane %v2626_v40, %v5736_v4  ;;  %v3534_v40 = vld [vmem:[#allocation5 + $0x2b0] sm:$0xff]  ;;  %v3533_v45 = vld [vmem:[#allocation5 + $0x2a8] sm:$0xff] }
0x107a   :  { %v2644_v24 = vcombine.low %v2625_v47, %v2641_v22  ;;  %v2643_v48 = vcombine.high %v2618_v35, %v2634_v43  ;;  %v2642_v52 = vcombine.low %v2618_v35, %v2634_v43  ;;  %v2645_v37 = vcombine.high %v2625_v47, %v2641_v22  ;;  %v3532_v47 = vld [vmem:[#allocation5 + $0x2a0] sm:$0xff]  ;;  %v3531_v22 = vld [vmem:[#allocation5 + $0x298] sm:$0xff]  ;;  %v3530_v35 = vld [vmem:[#allocation5 + $0x290] sm:$0xff] }
0x107b   :  { %v3529_v43 = vld [vmem:[#allocation5 + $0x288] sm:$0xff] }
0x107c   :  { %2651 = vrot.lane.b32.xlu1 %v2644_v24, %s5650_s27  ;;  %2647 = vrot.lane.b32.xlu0 %v2643_v48, %s5649_s26 }
0x1080   :  { %2655 = vrot.lane.b32.xlu0 %v2645_v37, %s5648_s25 }
0x10ee   :  { %v2648_v49 = vpop.permute.xlu0 %2647  ;;  %v2652_v38 = vpop.permute.xlu1 %2651 }
0x10ef   :  { %v2658_v55 = vsel %vm134_vm4, %v2642_v52, %v2648_v49 }
0x10f0   :  { %v2660_v56 = vsel %vm2659_vm9, %v2658_v55, %v2652_v38 }
0x10f2   :  { %v2656_v54 = vpop.permute.xlu0 %2655 }
0x10f3   :  { %v2662_v58 = vsel %vm2661_vm10, %v2660_v56, %v2656_v54 }
0x10f4   :  { %v2663_v61 = vmax.f32 %v2662_v58, 0.0 }
0x10f6   :  { %5280 = vmatmul.mubr.f32.vlgmr.msra.gmra.mxu0 %v2663_v61 }
0x10f7   :  { %5354 = vmatprep.mubr.msk.f32.mxu0 %vm5639_vm0, %v5638_v0 }
0x11b6   :  { %v2751_v59 = vpop.f32.mrf.mxu0 }
0x11b7   :  { %v2752_v2 = vadd.f32 %v4873_v62, %v2751_v59 }
0x11b8   :  { %v5281_v3 = vpop.f32.mrf.mxu0 }
0x11b9   :  { %2759 = vrot.lane.b32.xlu0 %v2752_v2, %s5650_s27  ;;  %2756 = vrot.lane.b32.xlu1 %v2752_v2, %s5648_s25 }
0x11bd   :  { %2762 = vrot.lane.b32.xlu1 %v2752_v2, %s5649_s26 }
0x122b   :  { %v2760_v7 = vpop.permute.xlu0 %2759  ;;  %v2757_v8 = vpop.permute.xlu1 %2756 }
0x122c   :  { %v2765_v26 = vcombine.low %v2752_v2, %v2760_v7  ;;  %v2766_v23 = vcombine.high %v2752_v2, %v2760_v7 }
0x122e   :  { %v2773_v14 = vrot.slane %v2765_v26, %v5733_v60  ;;  %v2780_v28 = vrot.slane %v2766_v23, %v5733_v60  ;;  %v3527_v26 = vld [vmem:[#allocation5 + $0x278] sm:$0xff] }
0x122f   :  { %v2763_v10 = vpop.permute.xlu1 %2762 }
0x1230   :  { %v2781_v11 = vcombine.low %v2757_v8, %v2763_v10  ;;  %v2782_v18 = vcombine.high %v2757_v8, %v2763_v10  ;;  %v3528_v8 = vld [vmem:[#allocation5 + $0x280] sm:$0xff] }
0x1232   :  { %v2789_v25 = vrot.slane %v2781_v11, %v5733_v60  ;;  %v2796_v32 = vrot.slane %v2782_v18, %v5733_v60  ;;  %v3526_v18 = vld [vmem:[#allocation5 + $0x270] sm:$0xff] }
0x1234   :  { %v2797_v15 = vcombine.low %v2773_v14, %v2789_v25  ;;  %v2798_v19 = vcombine.high %v2773_v14, %v2789_v25 }
0x1236   :  { %v2805_v33 = vrot.slane %v2797_v15, %v5736_v4  ;;  %v2812_v27 = vrot.slane %v2798_v19, %v5736_v4 }
0x1238   :  { %v2829_v21 = vcombine.high %v2805_v33, %v5638_v0  ;;  %5283 = vmatpush3.msk.msra.mxu1 %vm50_vm1, %v2805_v33  ;;  %v2830_v30 = vcombine.high %v2812_v27, %v5638_v0 }
0x1239   :  { %5285 = vmatmul.mubr.msk.f32.vlgmr.msra.gmra.mxu1 %vm787_vm6, %v5857_v9  ;;  %5287 = vmatprep.subr.mxu1 %v5638_v0  ;;  %v2813_v9 = vcombine.low %v2780_v28, %v2796_v32 }
0x123a   :  { %5288 = vmatpush3.msk.msra.mxu1 %vm50_vm1, %v2829_v21  ;;  %5289 = vmatprep.mubr.msk.f32.mxu1 %vm5639_vm0, %v5638_v0 }
0x123b   :  { %5292 = vmatprep.subr.mxu1 %v5638_v0 }
0x123d   :  { %5290 = vmatmul.mubr.msk.f32.vlgmr.msra.gmra.mxu1 %vm787_vm6, %v5853_v5  ;;  %v2821_v5 = vrot.slane %v2813_v9, %v5736_v4 }
0x123e   :  { %5293 = vmatpush3.msk.msra.mxu1 %vm50_vm1, %v2812_v27  ;;  %5294 = vmatprep.mubr.msk.f32.mxu1 %vm5639_vm0, %v5638_v0  ;;  %v3525_v27 = vld [vmem:[#allocation5 + $0x268] sm:$0xff] }
0x123f   :  { %5297 = vmatprep.subr.mxu1 %v5638_v0  ;;  %v2831_v44 = vcombine.high %v2821_v5, %v5638_v0 }
0x1241   :  { %5295 = vmatmul.mubr.msk.f32.vlgmr.msra.gmra.mxu1 %vm787_vm6, %v5855_v6  ;;  %v2814_v6 = vcombine.high %v2780_v28, %v2796_v32 }
0x1242   :  { %5298 = vmatpush3.msk.msra.mxu1 %vm50_vm1, %v2830_v30  ;;  %5299 = vmatprep.mubr.msk.f32.mxu1 %vm5639_vm0, %v5638_v0 }
0x1243   :  { %5302 = vmatprep.subr.mxu1 %v5638_v0 }
0x1245   :  { %5300 = vmatmul.mubr.msk.f32.vlgmr.msra.gmra.mxu1 %vm787_vm6, %v5851_v1  ;;  %v2828_v1 = vrot.slane %v2814_v6, %v5736_v4 }
0x1246   :  { %5303 = vmatpush3.msk.msra.mxu1 %vm50_vm1, %v2821_v5  ;;  %5304 = vmatprep.mubr.msk.f32.mxu1 %vm5639_vm0, %v5638_v0 }
0x1247   :  { %5307 = vmatprep.subr.mxu1 %v5638_v0 }
0x1249   :  { %5305 = vmatmul.mubr.msk.f32.vlgmr.msra.gmra.mxu1 %vm787_vm6, %v5863_v13  ;;  %v2832_v13 = vcombine.high %v2828_v1, %v5638_v0 }
0x124a   :  { %5308 = vmatpush3.msk.msra.mxu1 %vm50_vm1, %v2831_v44  ;;  %5309 = vmatprep.mubr.msk.f32.mxu1 %vm5639_vm0, %v5638_v0 }
0x124b   :  { %5312 = vmatprep.subr.mxu1 %v5638_v0 }
0x124d   :  { %5310 = vmatmul.mubr.msk.f32.vlgmr.msra.gmra.mxu1 %vm787_vm6, %v5867_v16  ;;  %v3540_v16 = vld [vmem:[#allocation5 + $0x2e0] sm:$0xff] }
0x124e   :  { %5313 = vmatpush3.msk.msra.mxu1 %vm50_vm1, %v2828_v1  ;;  %5314 = vmatprep.mubr.msk.f32.mxu1 %vm5639_vm0, %v5638_v0 }
0x124f   :  { %5317 = vmatprep.subr.mxu1 %v5638_v0  ;;  %5323 = vmatpush3.msra.mxu0 %v3540_v16 }
0x1250   :  { %5324 = vmatprep.subr.mxu0 %v5638_v0 }
0x1251   :  { %5315 = vmatmul.mubr.msk.f32.vlgmr.msra.gmra.mxu1 %vm787_vm6, %v5861_v12  ;;  %5325 = vmatpush3.msra.mxu0 %v3539_v20  ;;  %v3537_v12 = vld [vmem:[#allocation5 + $0x2c8] sm:$0xff] }
0x1252   :  { %5318 = vmatpush3.msk.msra.mxu1 %vm50_vm1, %v2832_v13  ;;  %5319 = vmatprep.mubr.msk.f32.mxu1 %vm5639_vm0, %v5638_v0 }
0x1253   :  { %5357 = vmatprep.subr.mxu1 %v5638_v0  ;;  %5326 = vmatprep.subr.mxu0 %v5638_v0 }
0x1254   :  { %5327 = vmatpush3.msra.mxu0 %v3538_v31 }
0x1255   :  { %5320 = vmatmul.mubr.msk.f32.vlgmr.msra.gmra.mxu1 %vm787_vm6, %v5869_v17  ;;  %5328 = vmatprep.subr.mxu0 %v5638_v0  ;;  %v3535_v17 = vld [vmem:[#allocation5 + $0x2b8] sm:$0xff] }
0x1256   :  { %5359 = vmatprep.mubr.msk.f32.mxu1 %vm5639_vm0, %v5638_v0  ;;  %5329 = vmatpush3.msra.mxu0 %v3537_v12 }
0x1257   :  { %5330 = vmatprep.subr.mxu0 %v5638_v0 }
0x1258   :  { %5331 = vmatpush3.msra.mxu0 %v3536_v29 }
0x1259   :  { %5332 = vmatprep.subr.mxu0 %v5638_v0 }
0x125a   :  { %5333 = vmatpush3.msra.mxu0 %v3535_v17 }
0x125b   :  { %5334 = vmatprep.subr.mxu0 %v5638_v0 }
0x125c   :  { %5335 = vmatpush3.msra.mxu0 %v3534_v40 }
0x125d   :  { %5336 = vmatprep.subr.mxu0 %v5638_v0 }
0x125e   :  { %5337 = vmatpush3.msra.mxu0 %v3533_v45 }
0x125f   :  { %5338 = vmatprep.subr.mxu0 %v5638_v0 }
0x1260   :  { %5339 = vmatpush3.msra.mxu0 %v3532_v47 }
0x1261   :  { %5340 = vmatprep.subr.mxu0 %v5638_v0 }
0x1262   :  { %5341 = vmatpush3.msra.mxu0 %v3531_v22  ;;  %v4890_v22 = vld [vmem:[#allocation5 + $0x2e8] ss:$0 sm:$0xff] }
0x1263   :  { %5342 = vmatprep.subr.mxu0 %v5638_v0 }
0x1264   :  { %5343 = vmatpush3.msra.mxu0 %v3530_v35 }
0x1265   :  { %5344 = vmatprep.subr.mxu0 %v5638_v0 }
0x1266   :  { %5345 = vmatpush3.msra.mxu0 %v3529_v43 }
0x1267   :  { %5346 = vmatprep.subr.mxu0 %v5638_v0 }
0x1268   :  { %5347 = vmatpush3.msra.mxu0 %v3528_v8 }
0x1269   :  { %5348 = vmatprep.subr.mxu0 %v5638_v0 }
0x126a   :  { %5349 = vmatpush3.msra.mxu0 %v3527_v26 }
0x126b   :  { %5350 = vmatprep.subr.mxu0 %v5638_v0 }
0x126c   :  { %5351 = vmatpush3.msra.mxu0 %v3526_v18  ;;  %v4393_v18 = vld [vmem:[#allocation5 + $0x328] sm:$0xff] }
0x126d   :  { %5352 = vmatprep.subr.mxu0 %v5638_v0 }
0x126e   :  { %5353 = vmatpush3.msra.mxu0 %v3525_v27 }
0x126f   :  { %5397 = vmatprep.subr.mxu0 %v5638_v0 }
0x12f9   :  { %v2905_v24 = vpop.f32.mrf.mxu1 }
0x12fb   :  { %v5286_v48 = vpop.f32.mrf.mxu1 }
0x12fd   :  { %v2981_v52 = vpop.f32.mrf.mxu1 }
0x12ff   :  { %v5291_v37 = vpop.f32.mrf.mxu1 }
0x1301   :  { %v3057_v49 = vpop.f32.mrf.mxu1 }
0x1302   :  { %v3441_v3 = vcombine.low %v2905_v24, %v3057_v49 }
0x1303   :  { %v5296_v38 = vpop.f32.mrf.mxu1 }
0x1304   :  { %v3448_v25 = vrot.slane %v3441_v3, %v5733_v60 }
0x1305   :  { %v3133_v55 = vpop.f32.mrf.mxu1 }
0x1306   :  { %v3449_v59 = vcombine.low %v2981_v52, %v3133_v55 }
0x1307   :  { %v5301_v54 = vpop.f32.mrf.mxu1 }
0x1308   :  { %v3456_v10 = vrot.slane %v3449_v59, %v5733_v60 }
0x1309   :  { %v3209_v56 = vpop.f32.mrf.mxu1 }
0x130a   :  { %v3473_v19 = vcombine.low %v3448_v25, %v3456_v10  ;;  %v3474_v21 = vcombine.high %v3448_v25, %v3456_v10  ;;  %v4397_v25 = vld [vmem:[#allocation5 + $0x348] sm:$0xff] }
0x130b   :  { %v5306_v58 = vpop.f32.mrf.mxu1 }
0x130c   :  { %v3488_v30 = vrot.slane %v3474_v21, %v5736_v4  ;;  %v3481_v6 = vrot.slane %v3473_v19, %v5736_v4  ;;  %v4392_v19 = vld [vmem:[#allocation5 + $0x320] sm:$0xff]  ;;  %v4391_v21 = vld [vmem:[#allocation5 + $0x318] sm:$0xff] }
0x130d   :  { %v3285_v61 = vpop.f32.mrf.mxu1 }
0x130f   :  { %v5311_v62 = vpop.f32.mrf.mxu1 }
0x1311   :  { %v3361_v2 = vpop.f32.mrf.mxu1 }
0x1312   :  { %v3457_v11 = vcombine.low %v3209_v56, %v3361_v2 }
0x1313   :  { %v5316_v7 = vpop.f32.mrf.mxu1 }
0x1314   :  { %v3464_v23 = vrot.slane %v3457_v11, %v5733_v60  ;;  %v4400_v11 = vld [vmem:[#allocation5 + $0x360] sm:$0xff] }
0x1315   :  { %v3437_v14 = vpop.f32.mrf.mxu1 }
0x1316   :  { %v3465_v15 = vcombine.low %v3285_v61, %v3437_v14  ;;  %v4399_v14 = vld [vmem:[#allocation5 + $0x358] sm:$0xff] }
0x1317   :  { %v5321_v33 = vpop.f32.mrf.mxu1 }
0x1318   :  { %v3472_v32 = vrot.slane %v3465_v15, %v5733_v60  ;;  %v4395_v15 = vld [vmem:[#allocation5 + $0x338] sm:$0xff]  ;;  %v4394_v33 = vld [vmem:[#allocation5 + $0x330] sm:$0xff] }
0x131a   :  { %v3489_v28 = vcombine.low %v3464_v23, %v3472_v32  ;;  %v3490_v9 = vcombine.high %v3464_v23, %v3472_v32  ;;  %v4390_v23 = vld [vmem:[#allocation5 + $0x310] sm:$0xff] }
0x131c   :  { %v3504_v5 = vrot.slane %v3490_v9, %v5736_v4  ;;  %v3497_v44 = vrot.slane %v3489_v28, %v5736_v4 }
0x131e   :  { %v3507_v1 = vcombine.low %v3488_v30, %v3504_v5  ;;  %v3506_v13 = vcombine.high %v3481_v6, %v3497_v44  ;;  %v3505_v16 = vcombine.low %v3481_v6, %v3497_v44  ;;  %v3508_v20 = vcombine.high %v3488_v30, %v3504_v5 }
0x1320   :  { %3514 = vrot.lane.b32.xlu1 %v3507_v1, %s5650_s27  ;;  %3510 = vrot.lane.b32.xlu0 %v3506_v13, %s5649_s26 }
0x1324   :  { %3518 = vrot.lane.b32.xlu0 %v3508_v20, %s5648_s25 }
0x1392   :  { %v3511_v31 = vpop.permute.xlu0 %3510  ;;  %v3515_v12 = vpop.permute.xlu1 %3514 }
0x1393   :  { %v3521_v29 = vsel %vm134_vm4, %v3505_v16, %v3511_v31 }
0x1394   :  { %v3522_v40 = vsel %vm2659_vm9, %v3521_v29, %v3515_v12 }
0x1396   :  { %v3519_v17 = vpop.permute.xlu0 %3518 }
0x1397   :  { %v3523_v45 = vsel %vm2661_vm10, %v3522_v40, %v3519_v17  ;;  %v4389_v40 = vld [vmem:[#allocation5 + $0x308] sm:$0xff] }
0x1398   :  { %v3524_v47 = vmax.f32 %v3523_v45, 0.0  ;;  %v4388_v45 = vld [vmem:[#allocation5 + $0x300] sm:$0xff] }
0x139a   :  { %5355 = vmatmul.mubr.f32.vlgmr.msra.gmra.mxu0 %v3524_v47 }
0x139b   :  { %5429 = vmatprep.mubr.msk.f32.mxu0 %vm5639_vm0, %v5638_v0 }
0x145a   :  { %v3612_v35 = vpop.f32.mrf.mxu0 }
0x145b   :  { %v3613_v43 = vadd.f32 %v4890_v22, %v3612_v35 }
0x145c   :  { %v5356_v24 = vpop.f32.mrf.mxu0 }
0x145d   :  { %3620 = vrot.lane.b32.xlu0 %v3613_v43, %s5650_s27  ;;  %3617 = vrot.lane.b32.xlu1 %v3613_v43, %s5648_s25 }
0x1461   :  { %3623 = vrot.lane.b32.xlu1 %v3613_v43, %s5649_s26 }
0x14cf   :  { %v3621_v48 = vpop.permute.xlu0 %3620  ;;  %v3618_v52 = vpop.permute.xlu1 %3617 }
0x14d0   :  { %v3626_v37 = vcombine.low %v3613_v43, %v3621_v48  ;;  %v3627_v2 = vcombine.high %v3613_v43, %v3621_v48 }
0x14d2   :  { %v3634_v55 = vrot.slane %v3626_v37, %v5733_v60  ;;  %v3641_v8 = vrot.slane %v3627_v2, %v5733_v60 }
0x14d3   :  { %v3624_v49 = vpop.permute.xlu1 %3623 }
0x14d4   :  { %v3642_v38 = vcombine.low %v3618_v52, %v3624_v49  ;;  %v3643_v61 = vcombine.high %v3618_v52, %v3624_v49  ;;  %v4387_v52 = vld [vmem:[#allocation5 + $0x2f8] sm:$0xff] }
0x14d6   :  { %v3650_v54 = vrot.slane %v3642_v38, %v5733_v60  ;;  %v3657_v3 = vrot.slane %v3643_v61, %v5733_v60 }
0x14d8   :  { %v3658_v56 = vcombine.low %v3634_v55, %v3650_v54  ;;  %v3659_v62 = vcombine.high %v3634_v55, %v3650_v54  ;;  %v4386_v54 = vld [vmem:[#allocation5 + $0x2f0] sm:$0xff] }
0x14da   :  { %v3666_v58 = vrot.slane %v3658_v56, %v5736_v4  ;;  %v3673_v7 = vrot.slane %v3659_v62, %v5736_v4 }
0x14dc   :  { %v3690_v59 = vcombine.high %v3666_v58, %v5638_v0  ;;  %5358 = vmatpush3.msk.msra.mxu1 %vm50_vm1, %v3666_v58  ;;  %v3691_v26 = vcombine.high %v3673_v7, %v5638_v0 }
0x14dd   :  { %5360 = vmatmul.mubr.msk.f32.vlgmr.msra.gmra.mxu1 %vm787_vm6, %v5956_v41  ;;  %5362 = vmatprep.subr.mxu1 %v5638_v0  ;;  %v3674_v41 = vcombine.low %v3641_v8, %v3657_v3 }
0x14de   :  { %5363 = vmatpush3.msk.msra.mxu1 %vm50_vm1, %v3690_v59  ;;  %5364 = vmatprep.mubr.msk.f32.mxu1 %vm5639_vm0, %v5638_v0 }
0x14df   :  { %5367 = vmatprep.subr.mxu1 %v5638_v0 }
0x14e1   :  { %5365 = vmatmul.mubr.msk.f32.vlgmr.msra.gmra.mxu1 %vm787_vm6, %v5952_v36  ;;  %v3682_v36 = vrot.slane %v3674_v41, %v5736_v4 }
0x14e2   :  { %5368 = vmatpush3.msk.msra.mxu1 %vm50_vm1, %v3673_v7  ;;  %5369 = vmatprep.mubr.msk.f32.mxu1 %vm5639_vm0, %v5638_v0 }
0x14e3   :  { %5372 = vmatprep.subr.mxu1 %v5638_v0  ;;  %v3692_v10 = vcombine.high %v3682_v36, %v5638_v0 }
0x14e5   :  { %5370 = vmatmul.mubr.msk.f32.vlgmr.msra.gmra.mxu1 %vm787_vm6, %v5954_v39  ;;  %v3675_v39 = vcombine.high %v3641_v8, %v3657_v3 }
0x14e6   :  { %5373 = vmatpush3.msk.msra.mxu1 %vm50_vm1, %v3691_v26  ;;  %5374 = vmatprep.mubr.msk.f32.mxu1 %vm5639_vm0, %v5638_v0  ;;  %v4853_v26 = vld [vmem:[#allocation5 + $0x1b0] ss:$0 sm:$0xff] }
0x14e7   :  { %5377 = vmatprep.subr.mxu1 %v5638_v0 }
0x14e9   :  { %5375 = vmatmul.mubr.msk.f32.vlgmr.msra.gmra.mxu1 %vm787_vm6, %v5950_v34  ;;  %v3689_v34 = vrot.slane %v3675_v39, %v5736_v4 }
0x14ea   :  { %5378 = vmatpush3.msk.msra.mxu1 %vm50_vm1, %v3682_v36  ;;  %5379 = vmatprep.mubr.msk.f32.mxu1 %vm5639_vm0, %v5638_v0  ;;  %v1796_v36 = vadd.f32 %v4853_v26, %v6095_v63 }
0x14eb   :  { %5382 = vmatprep.subr.mxu1 %v5638_v0 }
0x14ec   :  { %v1799_v39 = vsel %vm787_vm6, %v1796_v36, -inf }
0x14ed   :  { %5380 = vmatmul.mubr.msk.f32.vlgmr.msra.gmra.mxu1 %vm787_vm6, %v5962_v46  ;;  %v3693_v46 = vcombine.high %v3689_v34, %v5638_v0 }
0x14ee   :  { %5383 = vmatpush3.msk.msra.mxu1 %vm50_vm1, %v3692_v10  ;;  %5384 = vmatprep.mubr.msk.f32.mxu1 %vm5639_vm0, %v5638_v0 }
0x14ef   :  { %5387 = vmatprep.subr.mxu1 %v5638_v0 }
0x14f1   :  { %5385 = vmatmul.mubr.msk.f32.vlgmr.msra.gmra.mxu1 %vm787_vm6, %v5966_v50  ;;  %v4401_v50 = vld [vmem:[#allocation5 + $0x368] sm:$0xff] }
0x14f2   :  { %5388 = vmatpush3.msk.msra.mxu1 %vm50_vm1, %v3689_v34  ;;  %5389 = vmatprep.mubr.msk.f32.mxu1 %vm5639_vm0, %v5638_v0 }
0x14f3   :  { %5392 = vmatprep.subr.mxu1 %v5638_v0  ;;  %5398 = vmatpush3.msra.mxu0 %v4401_v50 }
0x14f4   :  { %5399 = vmatprep.subr.mxu0 %v5638_v0 }
0x14f5   :  { %5390 = vmatmul.mubr.msk.f32.vlgmr.msra.gmra.mxu1 %vm787_vm6, %v5958_v42  ;;  %5400 = vmatpush3.msra.mxu0 %v4400_v11  ;;  %v4398_v42 = vld [vmem:[#allocation5 + $0x350] sm:$0xff] }
0x14f6   :  { %5393 = vmatpush3.msk.msra.mxu1 %vm50_vm1, %v3693_v46  ;;  %5394 = vmatprep.mubr.msk.f32.mxu1 %vm5639_vm0, %v5638_v0  ;;  %vm4711_vm1 = vcmask 1046534  }
0x14f7   :  { %5432 = vmatprep.subr.mxu1 %v5638_v0  ;;  %5401 = vmatprep.subr.mxu0 %v5638_v0 }
0x14f8   :  { %5402 = vmatpush3.msra.mxu0 %v4399_v14 }
0x14f9   :  { %5395 = vmatmul.mubr.msk.f32.vlgmr.msra.gmra.mxu1 %vm787_vm6, %v5968_v51  ;;  %5403 = vmatprep.subr.mxu0 %v5638_v0  ;;  %v4396_v51 = vld [vmem:[#allocation5 + $0x340] sm:$0xff] }
0x14fa   :  { %5440 = vmatprep.mubr.msk.f32.mxu1 %vm5639_vm0, %v5638_v0  ;;  %5404 = vmatpush3.msra.mxu0 %v4398_v42  ;;  %vm4709_vm0 = vcmask 1045509  }
0x14fb   :  { %5405 = vmatprep.subr.mxu0 %v5638_v0 }
0x14fc   :  { %5406 = vmatpush3.msra.mxu0 %v4397_v25 }
0x14fd   :  { %5407 = vmatprep.subr.mxu0 %v5638_v0 }
0x14fe   :  { %5408 = vmatpush3.msra.mxu0 %v4396_v51 }
0x14ff   :  { %5409 = vmatprep.subr.mxu0 %v5638_v0 }
0x1500   :  { %5410 = vmatpush3.msra.mxu0 %v4395_v15 }
0x1501   :  { %5411 = vmatprep.subr.mxu0 %v5638_v0 }
0x1502   :  { %5412 = vmatpush3.msra.mxu0 %v4394_v33 }
0x1503   :  { %5413 = vmatprep.subr.mxu0 %v5638_v0 }
0x1504   :  { %5414 = vmatpush3.msra.mxu0 %v4393_v18  ;;  %v4907_v18 = vld [vmem:[#allocation5 + $0x370] ss:$0 sm:$0xff] }
0x1505   :  { %5415 = vmatprep.subr.mxu0 %v5638_v0 }
0x1506   :  { %5416 = vmatpush3.msra.mxu0 %v4392_v19 }
0x1507   :  { %5417 = vmatprep.subr.mxu0 %v5638_v0 }
0x1508   :  { %5418 = vmatpush3.msra.mxu0 %v4391_v21 }
0x1509   :  { %5419 = vmatprep.subr.mxu0 %v5638_v0 }
0x150a   :  { %5420 = vmatpush3.msra.mxu0 %v4390_v23 }
0x150b   :  { %5421 = vmatprep.subr.mxu0 %v5638_v0 }
0x150c   :  { %5422 = vmatpush3.msra.mxu0 %v4389_v40  ;;  %v4599_v40 = vsub.s32 6, %v5730_v57 }
0x150d   :  { %5423 = vmatprep.subr.mxu0 %v5638_v0 }
0x150e   :  { %5424 = vmatpush3.msra.mxu0 %v4388_v45 }
0x150f   :  { %5425 = vmatprep.subr.mxu0 %v5638_v0 }
0x1510   :  { %5426 = vmatpush3.msra.mxu0 %v4387_v52 }
0x1511   :  { %5427 = vmatprep.subr.mxu0 %v5638_v0 }
0x1512   :  { %5428 = vmatpush3.msra.mxu0 %v4386_v54 }
0x159d   :  { %v3766_v32 = vpop.f32.mrf.mxu1 }
0x159f   :  { %v5361_v27 = vpop.f32.mrf.mxu1 }
0x15a0   :  { %v4564_v27 = vsub.s32 1, %v5730_v57 }
0x15a1   :  { %v3842_v28 = vpop.f32.mrf.mxu1 }
0x15a3   :  { %v5366_v9 = vpop.f32.mrf.mxu1 }
0x15a5   :  { %v3918_v30 = vpop.f32.mrf.mxu1 }
0x15a6   :  { %v4302_v29 = vcombine.low %v3766_v32, %v3918_v30 }
0x15a7   :  { %v5371_v5 = vpop.f32.mrf.mxu1 }
0x15a8   :  { %v4309_v43 = vrot.slane %v4302_v29, %v5733_v60 }
0x15a9   :  { %v3994_v6 = vpop.f32.mrf.mxu1 }
0x15aa   :  { %v4310_v31 = vcombine.low %v3842_v28, %v3994_v6  ;;  %v4557_v28 = vsub.s32 0, %v5730_v57 }
0x15ab   :  { %v5376_v44 = vpop.f32.mrf.mxu1 }
0x15ac   :  { %v4317_v47 = vrot.slane %v4310_v31, %v5733_v60  ;;  %v4578_v44 = vsub.s32 3, %v5730_v57  ;;  %v4585_v31 = vsub.s32 4, %v5730_v57 }
0x15ad   :  { %v4070_v1 = vpop.f32.mrf.mxu1 }
0x15ae   :  { %v4334_v37 = vcombine.low %v4309_v43, %v4317_v47  ;;  %v4335_v49 = vcombine.high %v4309_v43, %v4317_v47  ;;  %v4685_v43 = vld [vmem:[#allocation5 + $0x380] sm:$0xff] }
0x15af   :  { %v5381_v13 = vpop.f32.mrf.mxu1 }
0x15b0   :  { %v4349_v61 = vrot.slane %v4335_v49, %v5736_v4  ;;  %v4342_v59 = vrot.slane %v4334_v37, %v5736_v4 }
0x15b1   :  { %v4146_v16 = vpop.f32.mrf.mxu1 }
0x15b3   :  { %v5386_v20 = vpop.f32.mrf.mxu1 }
0x15b4   :  { %v4592_v20 = vsub.s32 5, %v5730_v57 }
0x15b5   :  { %v4222_v12 = vpop.f32.mrf.mxu1 }
0x15b6   :  { %v4318_v22 = vcombine.low %v4070_v1, %v4222_v12  ;;  %v4571_v1 = vsub.s32 2, %v5730_v57 }
0x15b7   :  { %v5391_v17 = vpop.f32.mrf.mxu1 }
0x15b8   :  { %v4325_v38 = vrot.slane %v4318_v22, %v5733_v60  ;;  %v4606_v17 = vsub.s32 7, %v5730_v57  ;;  %v4687_v22 = vld [vmem:[#allocation5 + $0x390] sm:$0xff] }
0x15b9   :  { %v4298_v35 = vpop.f32.mrf.mxu1  ;;  %5433 = vmatpush3.msra.mxu1 %v4687_v22 }
0x15ba   :  { %v4326_v24 = vcombine.low %v4146_v16, %v4298_v35  ;;  %v4686_v35 = vld [vmem:[#allocation5 + $0x388] sm:$0xff]  ;;  %5434 = vmatprep.subr.mxu1 %v5638_v0 }
0x15bb   :  { %v5396_v48 = vpop.f32.mrf.mxu1  ;;  %5435 = vmatpush3.msra.mxu1 %v4686_v35 }
0x15bc   :  { %v4333_v55 = vrot.slane %v4326_v24, %v5733_v60  ;;  %5436 = vmatprep.subr.mxu1 %v5638_v0  ;;  %v4684_v24 = vld [vmem:[#allocation5 + $0x378] sm:$0xff] }
0x15bd   :  { %5437 = vmatpush3.msra.mxu1 %v4685_v43 }
0x15be   :  { %v4350_v56 = vcombine.low %v4325_v38, %v4333_v55  ;;  %v4351_v58 = vcombine.high %v4325_v38, %v4333_v55  ;;  %5438 = vmatprep.subr.mxu1 %v5638_v0 }
0x15bf   :  { %5439 = vmatpush3.msra.mxu1 %v4684_v24 }
0x15c0   :  { %v4365_v62 = vrot.slane %v4351_v58, %v5736_v4  ;;  %v4358_v2 = vrot.slane %v4350_v56, %v5736_v4 }
0x15c2   :  { %v4368_v3 = vcombine.low %v4349_v61, %v4365_v62  ;;  %v4367_v7 = vcombine.high %v4342_v59, %v4358_v2  ;;  %v4366_v8 = vcombine.low %v4342_v59, %v4358_v2  ;;  %v4369_v41 = vcombine.high %v4349_v61, %v4365_v62 }
0x15c4   :  { %4375 = vrot.lane.b32.xlu1 %v4368_v3, %s5650_s27  ;;  %4371 = vrot.lane.b32.xlu0 %v4367_v7, %s5649_s26 }
0x15c8   :  { %4379 = vrot.lane.b32.xlu0 %v4369_v41, %s5648_s25 }
0x15e8   :  { %1800 = vmax.xlane.f32.xlu1 %v1799_v39 }
0x1636   :  { %v4372_v10 = vpop.permute.xlu0 %4371  ;;  %v4376_v34 = vpop.permute.xlu1 %4375 }
0x1637   :  { %v4382_v46 = vsel %vm134_vm4, %v4366_v8, %v4372_v10 }
0x1638   :  { %v4383_v11 = vsel %vm2659_vm9, %v4382_v46, %v4376_v34 }
0x163a   :  { %v4380_v50 = vpop.permute.xlu0 %4379 }
0x163b   :  { %v4384_v14 = vsel %vm2661_vm10, %v4383_v11, %v4380_v50 }
0x163c   :  { %v4385_v42 = vmax.f32 %v4384_v14, 0.0 }
0x163e   :  { %5430 = vmatmul.mubr.f32.vlgmr.msra.gmra.mxu0 %v4385_v42 }
0x1671   :  { %v1801_v25 = vpop.xlane.xlu1 %1800 }
0x1672   :  { %v1802_v51 = vsub.f32 %v1796_v36, %v1801_v25 }
0x1674   :  { %v1803_v15 = vmul.f32 1.442695, %v1802_v51 }
0x1676   :  { %5559 = vpow2.f32 %v1803_v15 }
0x1683   :  { %v5560_v33 = vpop.eup %5559 }
0x1684   :  { %v1805_v63 = vsel %vm787_vm6, %v5560_v33, 0.0 }
0x1685   :  { %1806 = vadd.xlane.f32.xlu0 %v1805_v63 }
0x16fe   :  { %v4473_v19 = vpop.f32.mrf.mxu0 }
0x16ff   :  { %v4474_v21 = vadd.f32 %v4907_v18, %v4473_v19 }
0x1700   :  { %v5431_v23 = vpop.f32.mrf.mxu0 }
0x1701   :  { %4481 = vrot.lane.b32.xlu1 %v4474_v21, %s5650_s27  ;;  %4478 = vrot.lane.b32.xlu0 %v4474_v21, %s5648_s25 }
0x1705   :  { %4484 = vrot.lane.b32.xlu1 %v4474_v21, %s5649_s26 }
0x170e   :  { %v1807_v32 = vpop.xlane.xlu0 %1806 }
0x170f   :  { %5561 = vrcp.f32 %v1807_v32 }
0x171c   :  { %v5562_v9 = vpop.eup %5561 }
0x171d   :  { %v1809_v30 = vmul.f32 %v5562_v9, %v5560_v33  ;;  %v5567_v33 = vld [vmem:[#allocation2] sm:$0xff] }
0x171f   :  { %v4565_v5 = vrot.slane %v1809_v30, %v4564_v27  ;;  %v4558_v6 = vrot.slane %v1809_v30, %v4557_v28  ;;  %v4579_v13 = vrot.slane %v1809_v30, %v4578_v44  ;;  %v4572_v16 = vrot.slane %v1809_v30, %v4571_v1 }
0x1720   :  { %v4593_v12 = vrot.slane %v1809_v30, %v4592_v20  ;;  %v4586_v29 = vrot.slane %v1809_v30, %v4585_v31  ;;  %v4607_v45 = vrot.slane %v1809_v30, %v4606_v17  ;;  %v4600_v47 = vrot.slane %v1809_v30, %v4599_v40 }
0x1721   :  { %4567 = vbcast.lane.b32.xlu1 %v4565_v5, 256  ;;  %4560 = vbcast.lane.b32.xlu0 %v4558_v6, 256 }
0x1725   :  { %4581 = vbcast.lane.b32.xlu1 %v4579_v13, 256  ;;  %4574 = vbcast.lane.b32.xlu0 %v4572_v16, 256 }
0x1729   :  { %4595 = vbcast.lane.b32.xlu1 %v4593_v12, 256  ;;  %4588 = vbcast.lane.b32.xlu0 %v4586_v29, 256 }
0x172d   :  { %4609 = vbcast.lane.b32.xlu1 %v4607_v45, 256  ;;  %4602 = vbcast.lane.b32.xlu0 %v4600_v47, 256 }
0x1731   :  { %4802 = vrot.lane.b32.xlu1 %v1809_v30, %s5651_s28  ;;  %4791 = vrot.lane.b32.xlu0 %v5567_v33, %s5652_s29 }
0x1773   :  { %v4482_v57 = vpop.permute.xlu1 %4481  ;;  %v4479_v52 = vpop.permute.xlu0 %4478 }
0x1774   :  { %v4487_v49 = vcombine.low %v4474_v21, %v4482_v57  ;;  %v4488_v58 = vcombine.high %v4474_v21, %v4482_v57 }
0x1776   :  { %v4495_v55 = vrot.slane %v4487_v49, %v5733_v60  ;;  %v4502_v2 = vrot.slane %v4488_v58, %v5733_v60 }
0x1777   :  { %v4485_v48 = vpop.permute.xlu1 %4484 }
0x1778   :  { %v4503_v37 = vcombine.low %v4479_v52, %v4485_v48  ;;  %v4504_v54 = vcombine.high %v4479_v52, %v4485_v48 }
0x177a   :  { %v4511_v38 = vrot.slane %v4503_v37, %v5733_v60  ;;  %v4518_v61 = vrot.slane %v4504_v54, %v5733_v60 }
0x177c   :  { %v4519_v56 = vcombine.low %v4495_v55, %v4511_v38  ;;  %v4520_v62 = vcombine.high %v4495_v55, %v4511_v38  ;;  %v4535_v3 = vcombine.low %v4502_v2, %v4518_v61  ;;  %v4536_v10 = vcombine.high %v4502_v2, %v4518_v61 }
0x177e   :  { %v4527_v59 = vrot.slane %v4519_v56, %v5736_v4  ;;  %v4534_v8 = vrot.slane %v4520_v62, %v5736_v4  ;;  %v4543_v11 = vrot.slane %v4535_v3, %v5736_v4  ;;  %v4550_v32 = vrot.slane %v4536_v10, %v5736_v4 }
0x1780   :  { %v4551_v7 = vcombine.high %v4527_v59, %v5638_v0  ;;  %v4552_v50 = vcombine.high %v4534_v8, %v5638_v0  ;;  %v4553_v23 = vcombine.high %v4543_v11, %v5638_v0  ;;  %v4554_v17 = vcombine.high %v4550_v32, %v5638_v0 }
0x1793   :  { %v4568_v41 = vpop.permute.xlu1 %4567  ;;  %v4561_v26 = vpop.permute.xlu0 %4560 }
0x1794   :  { %v4612_v36 = vmul.f32 %v4568_v41, %v4551_v7  ;;  %v4611_v39 = vmul.f32 %v4561_v26, %v4527_v59 }
0x1796   :  { %v4627_v34 = vsel %vm4619_vm11, %v4612_v36, 0.0  ;;  %v4620_v46 = vsel %vm4619_vm11, %v4611_v39, 0.0 }
0x1797   :  { %v4628_v60 = vrot.slane %v4627_v34, 4  ;;  %v4621_v14 = vrot.slane %v4620_v46, 4  ;;  %v4582_v42 = vpop.permute.xlu1 %4581  ;;  %v4575_v25 = vpop.permute.xlu0 %4574 }
0x1798   :  { %v4614_v51 = vmul.f32 %v4582_v42, %v4552_v50  ;;  %v4613_v15 = vmul.f32 %v4575_v25, %v4534_v8 }
0x1799   :  { %v4629_v63 = vadd.f32 %v4628_v60, %v4627_v34  ;;  %v4622_v18 = vadd.f32 %v4621_v14, %v4620_v46 }
0x179a   :  { %v4641_v19 = vsel %vm4619_vm11, %v4614_v51, 0.0  ;;  %v4634_v21 = vsel %vm4619_vm11, %v4613_v15, 0.0 }
0x179b   :  { %v4630_v27 = vrot.slane %v4629_v63, 2  ;;  %v4623_v28 = vrot.slane %v4622_v18, 2  ;;  %v4642_v9 = vrot.slane %v4641_v19, 4  ;;  %v4635_v30 = vrot.slane %v4634_v21, 4  ;;  %v4596_v5 = vpop.permute.xlu1 %4595  ;;  %v4589_v6 = vpop.permute.xlu0 %4588 }
0x179c   :  { %v4616_v44 = vmul.f32 %v4596_v5, %v4553_v23  ;;  %v4615_v1 = vmul.f32 %v4589_v6, %v4543_v11 }
0x179d   :  { %v4631_v13 = vadd.f32 %v4630_v27, %v4629_v63  ;;  %v4624_v16 = vadd.f32 %v4623_v28, %v4622_v18  ;;  %v4643_v20 = vadd.f32 %v4642_v9, %v4641_v19  ;;  %v4636_v31 = vadd.f32 %v4635_v30, %v4634_v21 }
0x179e   :  { %v4655_v12 = vsel %vm4619_vm11, %v4616_v44, 0.0  ;;  %v4648_v29 = vsel %vm4619_vm11, %v4615_v1, 0.0 }
0x179f   :  { %v4632_v4 = vrot.slane %v4631_v13, 1  ;;  %v4625_v40 = vrot.slane %v4624_v16, 1  ;;  %v4644_v45 = vrot.slane %v4643_v20, 2  ;;  %v4637_v47 = vrot.slane %v4636_v31, 2  ;;  %v4610_v22 = vpop.permute.xlu1 %4609  ;;  %v4603_v35 = vpop.permute.xlu0 %4602 }
0x17a0   :  { %v4656_v43 = vrot.slane %v4655_v12, 4  ;;  %v4649_v24 = vrot.slane %v4648_v29, 4  ;;  %v4618_v57 = vmul.f32 %v4610_v22, %v4554_v17  ;;  %v4617_v48 = vmul.f32 %v4603_v35, %v4550_v32 }
0x17a1   :  { %v4633_v52 = vadd.f32 %v4632_v4, %v4631_v13  ;;  %v4626_v37 = vadd.f32 %v4625_v40, %v4624_v16  ;;  %v4645_v49 = vadd.f32 %v4644_v45, %v4643_v20  ;;  %v4638_v38 = vadd.f32 %v4637_v47, %v4636_v31  ;;  %v4908_v20 = vld [vmem:[#allocation5 + $0x398] ss:$0 sm:$0xff] }
0x17a2   :  { %v4657_v55 = vadd.f32 %v4656_v43, %v4655_v12  ;;  %v4650_v54 = vadd.f32 %v4649_v24, %v4648_v29  ;;  %v4669_v56 = vsel %vm4619_vm11, %v4618_v57, 0.0  ;;  %v4662_v0 = vsel %vm4619_vm11, %v4617_v48, 0.0 }
0x17a3   :  { %v4677_v58 = vmax.f32 %v4633_v52, 0.0  ;;  %v4676_v61 = vmax.f32 %v4626_v37, 0.0  ;;  %v4646_v62 = vrot.slane %v4645_v49, 1  ;;  %v4639_v59 = vrot.slane %v4638_v38, 1  ;;  %v4803_v2 = vpop.permute.xlu1 %4802  ;;  %v4792_v45 = vpop.permute.xlu0 %4791 }
0x17a4   :  { %v4658_v3 = vrot.slane %v4657_v55, 2  ;;  %v4651_v7 = vrot.slane %v4650_v54, 2  ;;  %v4670_v8 = vrot.slane %v4669_v56, 4  ;;  %v4663_v41 = vrot.slane %v4662_v0, 4 }
0x17a5   :  { %v4647_v26 = vadd.f32 %v4646_v62, %v4645_v49  ;;  %v4640_v36 = vadd.f32 %v4639_v59, %v4638_v38  ;;  %v4805_v39 = vsel %vm1641_vm8, %v6001_v53, %v4803_v2  ;;  %v4702_v11 = vsel %vm4701_vm12, %v4677_v58, %v4676_v61 }
0x17a6   :  { %v4659_v10 = vadd.f32 %v4658_v3, %v4657_v55  ;;  %v4652_v34 = vadd.f32 %v4651_v7, %v4650_v54  ;;  %v4671_v46 = vadd.f32 %v4670_v8, %v4669_v56  ;;  %v4664_v50 = vadd.f32 %v4663_v41, %v4662_v0  ;;  %4807 = vrot.lane.b32.xlu1 %v4805_v39, %s5645_s22 }
0x17a7   :  { %v4678_v60 = vmax.f32 %v4640_v36, 0.0  ;;  %v4679_v15 = vmax.f32 %v4647_v26, 0.0 }
0x17a8   :  { %v4660_v14 = vrot.slane %v4659_v10, 1  ;;  %v4653_v42 = vrot.slane %v4652_v34, 1  ;;  %v4672_v25 = vrot.slane %v4671_v46, 2  ;;  %v4665_v51 = vrot.slane %v4664_v50, 2 }
0x17a9   :  { %v4704_v33 = vsel %vm4703_vm13, %v4678_v60, %v4702_v11 }
0x17aa   :  { %v4661_v63 = vadd.f32 %v4660_v14, %v4659_v10  ;;  %v4654_v18 = vadd.f32 %v4653_v42, %v4652_v34  ;;  %v4673_v19 = vadd.f32 %v4672_v25, %v4671_v46  ;;  %v4666_v53 = vadd.f32 %v4665_v51, %v4664_v50 }
0x17ab   :  { %v4706_v28 = vsel %vm4705_vm14, %v4679_v15, %v4704_v33 }
0x17ac   :  { %v4680_v21 = vmax.f32 %v4654_v18, 0.0  ;;  %v4674_v23 = vrot.slane %v4673_v19, 1  ;;  %v4667_v32 = vrot.slane %v4666_v53, 1  ;;  %v4681_v27 = vmax.f32 %v4661_v63, 0.0 }
0x17ae   :  { %v4675_v9 = vadd.f32 %v4674_v23, %v4673_v19  ;;  %v4668_v30 = vadd.f32 %v4667_v32, %v4666_v53  ;;  %v4708_v5 = vsel %vm4707_vm15, %v4680_v21, %v4706_v28 }
0x17af   :  { %v4710_v1 = vsel %vm4709_vm0, %v4681_v27, %v4708_v5 }
0x17b0   :  { %v4683_v6 = vmax.f32 %v4675_v9, 0.0  ;;  %v4682_v44 = vmax.f32 %v4668_v30, 0.0 }
0x17b2   :  { %v4712_v13 = vsel %vm4711_vm1, %v4682_v44, %v4710_v1 }
0x17b3   :  { %v4714_v16 = vsel %vm4713_vm2, %v4683_v6, %v4712_v13 }
0x17b4   :  { %5441 = vmatmul.mubr.msk.f32.vlgmr.msra.gmra.mxu1 %vm134_vm4, %v4714_v16 }
0x1818   :  { %v4808_v57 = vpop.permute.xlu1 %4807 }
0x1874   :  { %v4783_v31 = vpop.f32.mrf.mxu1 }
0x1875   :  { %v4784_v12 = vadd.f32 %v4908_v20, %v4783_v31 }
0x1876   :  { %v5442_v29 = vpop.f32.mrf.mxu1 }
0x1877   :  { %v4787_v17 = vmax.f32 %v4784_v12, -20.0 }
0x1879   :  { %v4788_v4 = vmin.f32 %v4787_v17, 2.0 }
0x187b   :  { %v4789_v40 = vmul.f32 1.442695, %v4788_v4 }
0x187d   :  { %5563 = vpow2.f32 %v4789_v40 }
0x188a   :  { %v5564_v47 = vpop.eup %5563 }
0x188b   :  { %v4794_v22 = vmul.f32 %v5564_v47, %v4792_v45 }
0x188d   :  { %4796 = vrot.lane.b32.xlu0 %v4794_v22, %s5642_s21 }
0x18ff   :  { %v4797_v35 = vpop.permute.xlu0 %4796 }
0x1900   :  { %v4799_v43 = vadd.f32 %v4797_v35, %v4784_v12 }
0x1902   :  { %5565 = vtanh.f32 %v4799_v43 }
0x190f   :  { %v5566_v24 = vpop.eup %5565 }
0x1910   :  { %v4810_v48 = vsel %vm787_vm6, %v5566_v24, %v4808_v57 }
0x1911   :  { %v4812_v52 = vsel %vm4811_vm3, %v4810_v48, 0.0 }
0x1912   :  { %4813 = vst [vmem:[#allocation7] sm:$0xff] %v4812_v52 }
0x1913   :  { %5619 = shalt.err (!%p5616_p0)
}
0x1914   :  { %4823 = dma.vmem_to_hbm [thread:$0]  %s4821_s3, 128, %s6357_s2, [#allocation4]  }
0x1915   :  { %5632 = dma.done.wait [#allocation4], 128  }
0x1916   :  { %5633 = vsyncadd [#allocation4], 4294967168 }
0x1917   :  { %4827 = vsyncpa [#allocation3], 1 }
0x1918   :  { %4828 = vsyncpa [#allocation6], 1 }
0x1919   :  { %4829 = vsyncpa [#allocation4], 1 }

</bundles_post_ra>
